<compile_context>
chip_gen: v7x
topology: tpu7x:2x2x1
jax: 0.10.0
libtpu: 0.0.40
codegen_flags: <defaults>
</compile_context>

<pallas_src>
import functools

import jax
import jax.numpy as jnp
from jax.experimental import pallas as pl
from jax.experimental.pallas import tpu as pltpu


# ----------------------------- in-kernel helpers -----------------------------

def _layernorm(v, w, b, eps=1e-5):
    # v: [N, W] float32; w, b: [1, W]
    mu = jnp.mean(v, axis=-1, keepdims=True)
    var = jnp.mean(jnp.square(v - mu), axis=-1, keepdims=True)
    return (v - mu) * jax.lax.rsqrt(var + eps) * w + b


# --------------------------- fused transformer kernel ------------------------

def _encoder_kernel(x_ref,
                    ln1_w_ref, ln1_b_ref, qkv_wt_ref, qkv_b_ref,
                    out_wt_ref, out_b_ref, ln2_w_ref, ln2_b_ref,
                    fc_wt_ref, fc_b_ref, proj_wt_ref, proj_b_ref,
                    o_ref, attn_buf,
                    *, num_heads, seq_len, batch_per_block, mlp_chunks):
    layer = pl.program_id(1)

    # o_ref is the activation carry: its block index is constant over the layer axis, so
    # it stays resident in VMEM and only hits HBM after the last layer of this block.
    @pl.when(layer == 0)
    def _():
        o_ref[...] = x_ref[...]

    x = o_ref[...]                            # [rows, W] f32, VMEM-resident
    rows, W = x.shape
    L = seq_len
    Bb = batch_per_block
    H = num_heads
    dh = W // H

    # ---------------- attention branch ----------------
    x_ln = _layernorm(x, ln1_w_ref[0], ln1_b_ref[0])
    qkv = jnp.dot(x_ln.astype(jnp.bfloat16), qkv_wt_ref[0],
                  preferred_element_type=jnp.float32) + qkv_b_ref[0]      # [rows, 3W]

    # dh**-0.5 is pre-folded into the Q columns of qkv_wt/qkv_b at init; cast q/k/v once.
    q = qkv[:, 0 * W:1 * W].astype(jnp.bfloat16).reshape(Bb, L, W)
    k = qkv[:, 1 * W:2 * W].astype(jnp.bfloat16).reshape(Bb, L, W)
    v = qkv[:, 2 * W:3 * W].astype(jnp.bfloat16).reshape(Bb, L, W)

    # Additive causal mask built once per layer (finite large negative; diagonal unmasked).
    row_ids = jax.lax.broadcasted_iota(jnp.int32, (L, L), 0)
    col_ids = jax.lax.broadcasted_iota(jnp.int32, (L, L), 1)
    mask_add = jnp.where(row_ids >= col_ids, jnp.float32(0.0), jnp.float32(-1e30))

    # Per-head, batched over the Bb batch dim; each head's output is stored straight into
    # the bf16 attn_buf scratch (no value concatenates, no per-(batch,head) unroll).
    # TODO(synk): a single (Bb*H)-batched einsum needs a lane-splitting reshape/transpose
    # whose Mosaic lowering is not guaranteed at arbitrary dh; the H-loop keeps the MXU
    # work identical while batching over Bb.
    for h in range(H):
        cols = slice(h * dh, (h + 1) * dh)
        s = jnp.einsum('bqd,bkd->bqk', q[:, :, cols], k[:, :, cols],
                       preferred_element_type=jnp.float32)                # [Bb, L, L]
        s = s + mask_add
        s = s - jnp.max(s, axis=-1, keepdims=True)
        p = jnp.exp(s)
        p = p * pl.reciprocal(jnp.sum(p, axis=-1, keepdims=True), approx=True)
        pv = jnp.einsum('bqk,bkd->bqd', p.astype(jnp.bfloat16), v[:, :, cols],
                        preferred_element_type=jnp.float32)               # [Bb, L, dh]
        attn_buf[:, cols] = pv.reshape(rows, dh).astype(attn_buf.dtype)

    attn = jnp.dot(attn_buf[...], out_wt_ref[0],
                   preferred_element_type=jnp.float32) + out_b_ref[0]
    x = x + attn

    # ---------------- MLP branch (hidden dim chunked) ----------------
    # QuickGELU applied per W-wide chunk of the 4W hidden dim and h2 accumulated, so the
    # f32 [rows, 4W] intermediate never fully materializes.
    x_ln2 = _layernorm(x, ln2_w_ref[0], ln2_b_ref[0]).astype(jnp.bfloat16)
    hidden = fc_wt_ref.shape[-1]                     # 4W
    chunk = hidden // mlp_chunks
    h2 = jnp.zeros((rows, W), jnp.float32)
    for c in range(mlp_chunks):
        cs = slice(c * chunk, (c + 1) * chunk)
        h1c = jnp.dot(x_ln2, fc_wt_ref[0, :, cs],
                      preferred_element_type=jnp.float32) + fc_b_ref[0, :, cs]
        h1c = h1c * jax.nn.sigmoid(1.702 * h1c)      # QuickGELU (f32; bf16 optional on v6e/v7x)
        h2 = h2 + jnp.dot(h1c.astype(jnp.bfloat16), proj_wt_ref[0, cs, :],
                          preferred_element_type=jnp.float32)
    x = x + h2 + proj_b_ref[0]

    o_ref[...] = x                                   # carry; HBM writeback after last layer


_WEIGHT_KEYS = ('ln1_w', 'ln1_b', 'qkv_wt', 'qkv_b', 'out_wt', 'out_b',
                'ln2_w', 'ln2_b', 'fc_wt', 'fc_b', 'proj_wt', 'proj_b')


def _vmem_limit_bytes():
    # ~75% of physical VMEM: 48 MiB on v7x (64 MiB/core), 96 MiB on v5e/v6e (128 MiB).
    try:
        return int(pltpu.get_tpu_info().vmem_capacity_bytes * 3 // 4)
    except Exception:
        return 48 * 1024 * 1024


def _pick_batch_block(batch):
    # >=2 blocks (when batch >= 2) so the "parallel" batch axis can shard across the two
    # v7x TensorCores; otherwise pick the largest block (amortizes weight streaming).
    if batch >= 2:
        for cand in (batch // 2, 1):
            if cand >= 1 and batch % cand == 0:
                return cand
    return batch


def transformer_stack(x2d, params, *, num_heads, seq_len, batch_block, mlp_chunks=4):
    N, W = x2d.shape
    batch = N // seq_len
    assert batch % batch_block == 0
    assert W % num_heads == 0
    n_layers = params['qkv_wt'].shape[0]
    hidden = params['fc_wt'].shape[-1]
    assert hidden % mlp_chunks == 0
    rows = batch_block * seq_len
    # NOTE: rows (= batch_block * seq_len) should be a multiple of 8 for sublane-aligned
    # tiles; the demo uses seq_len=8.  TODO(synk): pad seq_len to a multiple of 8 (e.g.
    # 77 -> 80) for real CLIP context lengths.

    kernel = functools.partial(_encoder_kernel, num_heads=num_heads,
                               seq_len=seq_len, batch_per_block=batch_block,
                               mlp_chunks=mlp_chunks)

    def wspec(name):
        shape = params[name].shape          # [n_layers, a, b] — stream one layer slice
        return pl.BlockSpec((1,) + shape[1:], lambda b, l: (l, 0, 0))

    return pl.pallas_call(
        kernel,
        out_shape=jax.ShapeDtypeStruct((N, W), jnp.float32),
        grid=(batch // batch_block, n_layers),
        in_specs=[pl.BlockSpec((rows, W), lambda b, l: (b, 0))] +
                 [wspec(k) for k in _WEIGHT_KEYS],
        out_specs=pl.BlockSpec((rows, W), lambda b, l: (b, 0)),
        scratch_shapes=[pltpu.VMEM((rows, W), jnp.bfloat16)],   # per-head attn staging
        input_output_aliases={0: 0},                            # x block carried in-place
        compiler_params=pltpu.CompilerParams(
            dimension_semantics=("parallel", "arbitrary"),
            vmem_limit_bytes=_vmem_limit_bytes()),
    )(x2d, *[params[k] for k in _WEIGHT_KEYS])


# ------------------------------ parameter setup -------------------------------

def init_params(key, *, embed_dim, context_length, vocab_size, width, heads, layers):
    attn_std = width ** (-0.5)
    proj_std = width ** (-0.5) * (2 * layers) ** (-0.5)
    fc_std = (2 * width) ** (-0.5)
    W, NL = width, layers
    dh = width // heads
    scale = dh ** (-0.5)
    keys = jax.random.split(key, 7)

    def normal(k, shape, std):
        return std * jax.random.normal(k, shape, dtype=jnp.float32)

    # qkv projection stored [in, out]; the attention scale dh**-0.5 is folded into the
    # Q columns (and Q bias) so the kernel never multiplies by it at runtime.
    qkv_w = normal(keys[3], (NL, W, 3 * W), attn_std)
    qkv_w = qkv_w.at[:, :, :W].multiply(scale)
    qkv_b = jnp.zeros((NL, 1, 3 * W), jnp.float32)          # if nonzero, Q part must be scaled too

    return {
        'token_embedding': normal(keys[0], (vocab_size, W), 0.02),
        'positional_embedding': normal(keys[1], (context_length, W), 0.01),
        'ln_final_w': jnp.ones((W,), jnp.float32),
        'ln_final_b': jnp.zeros((W,), jnp.float32),
        'text_projection': normal(keys[2], (W, embed_dim), W ** (-0.5)),
        # ---- per-layer weights, stacked on a leading layer axis; matmul weights bf16 ----
        'ln1_w': jnp.ones((NL, 1, W), jnp.float32),
        'ln1_b': jnp.zeros((NL, 1, W), jnp.float32),
        'qkv_wt': qkv_w.astype(jnp.bfloat16),
        'qkv_b': qkv_b,
        'out_wt': normal(keys[4], (NL, W, W), proj_std).astype(jnp.bfloat16),
        'out_b': jnp.zeros((NL, 1, W), jnp.float32),
        'ln2_w': jnp.ones((NL, 1, W), jnp.float32),
        'ln2_b': jnp.zeros((NL, 1, W), jnp.float32),
        'fc_wt': normal(keys[5], (NL, W, 4 * W), fc_std).astype(jnp.bfloat16),
        'fc_b': jnp.zeros((NL, 1, 4 * W), jnp.float32),
        'proj_wt': normal(keys[6], (NL, 4 * W, W), proj_std).astype(jnp.bfloat16),
        'proj_b': jnp.zeros((NL, 1, W), jnp.float32),
    }


# --------------------------------- forward ------------------------------------

def text_encoder_forward(text, params, *, num_heads, context_length):
    B = text.shape[0]
    W = params['token_embedding'].shape[1]

    # glue: token embedding lookup + positional embedding
    x = params['token_embedding'][text] + params['positional_embedding']
    x = x.astype(jnp.float32).reshape(B * context_length, W)

    # fused transformer stack: one pallas_call over (batch_blocks, layers)
    x = transformer_stack(x, params, num_heads=num_heads, seq_len=context_length,
                          batch_block=_pick_batch_block(B))
    x = x.reshape(B, context_length, W)

    # glue: final LayerNorm + EOT gather + text projection (tiny; plain JAX)
    mu = jnp.mean(x, axis=-1, keepdims=True)
    var = jnp.mean(jnp.square(x - mu), axis=-1, keepdims=True)
    x = (x - mu) * jax.lax.rsqrt(var + 1e-5) * params['ln_final_w'] + params['ln_final_b']
    eot = jnp.argmax(text, axis=-1)              # CLIP convention: EOT has the largest id
    x_eot = x[jnp.arange(B), eot]                                  # [B, W]
    return x_eot @ params['text_projection']                       # [B, E]


# ----------------------------------- main --------------------------------------

if __name__ == "__main__":
    EMBED_DIM = 32
    CONTEXT_LENGTH = 8
    VOCAB_SIZE = 64
    WIDTH = 32
    HEADS = 4
    LAYERS = 2
    BATCH = 2

    key = jax.random.PRNGKey(0)
    k_params, k_text = jax.random.split(key)

    params = init_params(k_params, embed_dim=EMBED_DIM, context_length=CONTEXT_LENGTH,
                         vocab_size=VOCAB_SIZE, width=WIDTH, heads=HEADS, layers=LAYERS)
    text = jax.random.randint(k_text, (BATCH, CONTEXT_LENGTH), 0, VOCAB_SIZE,
                              dtype=jnp.int32)

    fwd = jax.jit(functools.partial(text_encoder_forward, num_heads=HEADS,
                                    context_length=CONTEXT_LENGTH))
    out = jax.block_until_ready(fwd(text, params))
    assert out.shape == (BATCH, EMBED_DIM) and out.dtype == jnp.float32
    print("KERNEL_OK")
</pallas_src>

<mosaic_0001>
module attributes {stable_mosaic.version = 11 : i64} {
  func.func @_encoder_kernel(%arg0: i32, %arg1: i32, %arg2: memref<8x32xf32, #tpu.memory_space<vmem>>, %arg3: memref<1x1x32xf32, #tpu.memory_space<vmem>>, %arg4: memref<1x1x32xf32, #tpu.memory_space<vmem>>, %arg5: memref<1x32x96xbf16, #tpu.memory_space<vmem>>, %arg6: memref<1x1x96xf32, #tpu.memory_space<vmem>>, %arg7: memref<1x32x32xbf16, #tpu.memory_space<vmem>>, %arg8: memref<1x1x32xf32, #tpu.memory_space<vmem>>, %arg9: memref<1x1x32xf32, #tpu.memory_space<vmem>>, %arg10: memref<1x1x32xf32, #tpu.memory_space<vmem>>, %arg11: memref<1x32x128xbf16, #tpu.memory_space<vmem>>, %arg12: memref<1x1x128xf32, #tpu.memory_space<vmem>>, %arg13: memref<1x128x32xbf16, #tpu.memory_space<vmem>>, %arg14: memref<1x1x32xf32, #tpu.memory_space<vmem>>, %arg15: memref<8x32xf32, #tpu.memory_space<vmem>>, %arg16: memref<8x32xbf16, #tpu.memory_space<vmem>>) attributes {dimension_semantics = [#tpu.dimension_semantics<parallel>, #tpu.dimension_semantics<arbitrary>], iteration_bounds = array<i64: 2, 2>, scalar_prefetch = 0 : i64, scratch_operands = 1 : i64, tpu.core_type = #tpu.core_type<tc>, window_params = [{transform_indices = @transform_0, window_bounds = array<i64: 8, 32>}, {transform_indices = @transform_1, window_bounds = array<i64: 1, 1, 32>}, {transform_indices = @transform_2, window_bounds = array<i64: 1, 1, 32>}, {transform_indices = @transform_3, window_bounds = array<i64: 1, 32, 96>}, {transform_indices = @transform_4, window_bounds = array<i64: 1, 1, 96>}, {transform_indices = @transform_5, window_bounds = array<i64: 1, 32, 32>}, {transform_indices = @transform_6, window_bounds = array<i64: 1, 1, 32>}, {transform_indices = @transform_7, window_bounds = array<i64: 1, 1, 32>}, {transform_indices = @transform_8, window_bounds = array<i64: 1, 1, 32>}, {transform_indices = @transform_9, window_bounds = array<i64: 1, 32, 128>}, {transform_indices = @transform_10, window_bounds = array<i64: 1, 1, 128>}, {transform_indices = @transform_11, window_bounds = array<i64: 1, 128, 32>}, {transform_indices = @transform_12, window_bounds = array<i64: 1, 1, 32>}, {transform_indices = @transform_13, window_bounds = array<i64: 8, 32>}]} {
    %c0_i32 = arith.constant 0 : i32
    %0 = arith.cmpi eq, %arg1, %c0_i32 : i32
    %1 = arith.extui %0 : i1 to i32
    %c0_i32_0 = arith.constant 0 : i32
    %2 = arith.cmpi ne, %1, %c0_i32_0 : i32
    scf.if %2 {
      %c0_117 = arith.constant 0 : index
      %c0_118 = arith.constant 0 : index
      %260 = vector.load %arg2[%c0_117, %c0_118] : memref<8x32xf32, #tpu.memory_space<vmem>>, vector<8x32xf32>
      %c0_119 = arith.constant 0 : index
      %c0_120 = arith.constant 0 : index
      %261 = vector.load %arg15[%c0_119, %c0_120] : memref<8x32xf32, #tpu.memory_space<vmem>>, vector<8x32xf32>
      tpu.vector_store %arg15[%c0_119, %c0_120], %260 {strides = array<i32>} : memref<8x32xf32, #tpu.memory_space<vmem>>, vector<8x32xf32>,
    } else {
    }
    %c0 = arith.constant 0 : index
    %c0_1 = arith.constant 0 : index
    %3 = vector.load %arg15[%c0, %c0_1] : memref<8x32xf32, #tpu.memory_space<vmem>>, vector<8x32xf32>
    %c0_2 = arith.constant 0 : index
    %c0_3 = arith.constant 0 : index
    %c0_4 = arith.constant 0 : index
    %4 = vector.load %arg3[%c0_2, %c0_3, %c0_4] : memref<1x1x32xf32, #tpu.memory_space<vmem>>, vector<1x1x32xf32>
    %5 = vector.shape_cast %4 : vector<1x1x32xf32> to vector<1x32xf32>
    %c0_5 = arith.constant 0 : index
    %c0_6 = arith.constant 0 : index
    %c0_7 = arith.constant 0 : index
    %6 = vector.load %arg4[%c0_5, %c0_6, %c0_7] : memref<1x1x32xf32, #tpu.memory_space<vmem>>, vector<1x1x32xf32>
    %7 = vector.shape_cast %6 : vector<1x1x32xf32> to vector<1x32xf32>
    %cst = arith.constant dense<0.000000e+00> : vector<8xf32>
    %8 = vector.multi_reduction <add>, %3, %cst [1] : vector<8x32xf32> to vector<8xf32>
    %9 = vector.shape_cast %8 : vector<8xf32> to vector<8x1xf32>
    %cst_8 = arith.constant 3.200000e+01 : f32
    %10 = vector.broadcast %cst_8 : f32 to vector<8x1xf32>
    %11 = arith.divf %9, %10 : vector<8x1xf32>
    %12 = vector.broadcast %11 : vector<8x1xf32> to vector<8x32xf32>
    %13 = arith.subf %3, %12 : vector<8x32xf32>
    %14 = arith.mulf %13, %13 : vector<8x32xf32>
    %cst_9 = arith.constant dense<0.000000e+00> : vector<8xf32>
    %15 = vector.multi_reduction <add>, %14, %cst_9 [1] : vector<8x32xf32> to vector<8xf32>
    %16 = vector.shape_cast %15 : vector<8xf32> to vector<8x1xf32>
    %cst_10 = arith.constant 3.200000e+01 : f32
    %17 = vector.broadcast %cst_10 : f32 to vector<8x1xf32>
    %18 = arith.divf %16, %17 : vector<8x1xf32>
    %19 = vector.broadcast %11 : vector<8x1xf32> to vector<8x32xf32>
    %20 = arith.subf %3, %19 : vector<8x32xf32>
    %cst_11 = arith.constant 9.99999974E-6 : f32
    %21 = vector.broadcast %cst_11 : f32 to vector<8x1xf32>
    %22 = arith.addf %18, %21 : vector<8x1xf32>
    %23 = math.rsqrt %22 : vector<8x1xf32>
    %24 = vector.broadcast %23 : vector<8x1xf32> to vector<8x32xf32>
    %25 = arith.mulf %20, %24 : vector<8x32xf32>
    %26 = vector.broadcast %5 : vector<1x32xf32> to vector<8x32xf32>
    %27 = arith.mulf %25, %26 : vector<8x32xf32>
    %28 = vector.broadcast %7 : vector<1x32xf32> to vector<8x32xf32>
    %29 = arith.addf %27, %28 : vector<8x32xf32>
    %30 = arith.truncf %29 : vector<8x32xf32> to vector<8x32xbf16>
    %c0_12 = arith.constant 0 : index
    %c0_13 = arith.constant 0 : index
    %c0_14 = arith.constant 0 : index
    %31 = vector.load %arg5[%c0_12, %c0_13, %c0_14] : memref<1x32x96xbf16, #tpu.memory_space<vmem>>, vector<1x32x96xbf16>
    %32 = vector.shape_cast %31 : vector<1x32x96xbf16> to vector<32x96xbf16>
    %cst_15 = arith.constant dense<0.000000e+00> : vector<8x96xf32>
    %33 = tpu.matmul %30, %32, %cst_15 {dimension_numbers = #tpu.dot_dimension_numbers<[1], [0], [0], [1], [0, 0, 1, 1], [], []>} : vector<8x32xbf16>, vector<32x96xbf16>, vector<8x96xf32> -> vector<8x96xf32>
    %c0_16 = arith.constant 0 : index
    %c0_17 = arith.constant 0 : index
    %c0_18 = arith.constant 0 : index
    %34 = vector.load %arg6[%c0_16, %c0_17, %c0_18] : memref<1x1x96xf32, #tpu.memory_space<vmem>>, vector<1x1x96xf32>
    %35 = vector.shape_cast %34 : vector<1x1x96xf32> to vector<1x96xf32>
    %36 = vector.broadcast %35 : vector<1x96xf32> to vector<8x96xf32>
    %37 = arith.addf %33, %36 : vector<8x96xf32>
    %38 = vector.extract_strided_slice %37 {offsets = [0, 0], sizes = [8, 32], strides = [1, 1]} : vector<8x96xf32> to vector<8x32xf32>
    %39 = arith.truncf %38 : vector<8x32xf32> to vector<8x32xbf16>
    %40 = vector.shape_cast %39 : vector<8x32xbf16> to vector<1x8x32xbf16>
    %41 = vector.extract_strided_slice %37 {offsets = [0, 32], sizes = [8, 32], strides = [1, 1]} : vector<8x96xf32> to vector<8x32xf32>
    %42 = arith.truncf %41 : vector<8x32xf32> to vector<8x32xbf16>
    %43 = vector.shape_cast %42 : vector<8x32xbf16> to vector<1x8x32xbf16>
    %44 = vector.extract_strided_slice %37 {offsets = [0, 64], sizes = [8, 32], strides = [1, 1]} : vector<8x96xf32> to vector<8x32xf32>
    %45 = arith.truncf %44 : vector<8x32xf32> to vector<8x32xbf16>
    %46 = vector.shape_cast %45 : vector<8x32xbf16> to vector<1x8x32xbf16>
    %47 = tpu.iota {dimensions = array<i32: 0>} : vector<8x8xi32>
    %48 = tpu.iota {dimensions = array<i32: 1>} : vector<8x8xi32>
    %49 = arith.cmpi sge, %47, %48 : vector<8x8xi32>
    %cst_19 = arith.constant 0.000000e+00 : f32
    %cst_20 = arith.constant -1.000000e+30 : f32
    %50 = vector.broadcast %cst_19 : f32 to vector<8x8xf32>
    %51 = vector.broadcast %cst_20 : f32 to vector<8x8xf32>
    %52 = arith.select %49, %50, %51 : vector<8x8xi1>, vector<8x8xf32>
    %53 = vector.extract_strided_slice %40 {offsets = [0, 0, 0], sizes = [1, 8, 8], strides = [1, 1, 1]} : vector<1x8x32xbf16> to vector<1x8x8xbf16>
    %54 = vector.extract_strided_slice %43 {offsets = [0, 0, 0], sizes = [1, 8, 8], strides = [1, 1, 1]} : vector<1x8x32xbf16> to vector<1x8x8xbf16>
    "tpu.trace_start"() <{level = 10 : i32, message = "bqd,bkd->bqk"}> : () -> ()
    %cst_21 = arith.constant dense<0.000000e+00> : vector<1x8x8xf32>
    %55 = tpu.matmul %53, %54, %cst_21 {dimension_numbers = #tpu.dot_dimension_numbers<[2], [2], [1], [1], [0, 0, 0, 1, 1, 1], [0], [0]>} : vector<1x8x8xbf16>, vector<1x8x8xbf16>, vector<1x8x8xf32> -> vector<1x8x8xf32>
    "tpu.trace_stop"() : () -> ()
    %56 = vector.shape_cast %52 : vector<8x8xf32> to vector<1x8x8xf32>
    %57 = arith.addf %55, %56 : vector<1x8x8xf32>
    %cst_22 = arith.constant dense<0xFF800000> : vector<1x8xf32>
    %58 = vector.multi_reduction <maximumf>, %57, %cst_22 [2] : vector<1x8x8xf32> to vector<1x8xf32>
    %59 = vector.shape_cast %58 : vector<1x8xf32> to vector<1x8x1xf32>
    %60 = vector.broadcast %59 : vector<1x8x1xf32> to vector<1x8x8xf32>
    %61 = arith.subf %57, %60 : vector<1x8x8xf32>
    %62 = math.exp %61 : vector<1x8x8xf32>
    %cst_23 = arith.constant dense<0.000000e+00> : vector<1x8xf32>
    %63 = vector.multi_reduction <add>, %62, %cst_23 [2] : vector<1x8x8xf32> to vector<1x8xf32>
    %64 = vector.shape_cast %63 : vector<1x8xf32> to vector<1x8x1xf32>
    %65 = tpu.reciprocal %64 {approx = true} : vector<1x8x1xf32> -> vector<1x8x1xf32>
    %66 = vector.broadcast %65 : vector<1x8x1xf32> to vector<1x8x8xf32>
    %67 = arith.mulf %62, %66 : vector<1x8x8xf32>
    %68 = arith.truncf %67 : vector<1x8x8xf32> to vector<1x8x8xbf16>
    %69 = vector.extract_strided_slice %46 {offsets = [0, 0, 0], sizes = [1, 8, 8], strides = [1, 1, 1]} : vector<1x8x32xbf16> to vector<1x8x8xbf16>
    "tpu.trace_start"() <{level = 10 : i32, message = "bqk,bkd->bqd"}> : () -> ()
    %cst_24 = arith.constant dense<0.000000e+00> : vector<1x8x8xf32>
    %70 = tpu.matmul %68, %69, %cst_24 {dimension_numbers = #tpu.dot_dimension_numbers<[2], [1], [1], [2], [0, 0, 0, 1, 1, 2], [0], [0]>} : vector<1x8x8xbf16>, vector<1x8x8xbf16>, vector<1x8x8xf32> -> vector<1x8x8xf32>
    "tpu.trace_stop"() : () -> ()
    %71 = vector.shape_cast %70 : vector<1x8x8xf32> to vector<8x8xf32>
    %72 = arith.truncf %71 : vector<8x8xf32> to vector<8x8xbf16>
    %c0_25 = arith.constant 0 : index
    %c0_26 = arith.constant 0 : index
    %73 = vector.load %arg16[%c0_25, %c0_26] : memref<8x32xbf16, #tpu.memory_space<vmem>>, vector<8x8xbf16>
    tpu.vector_store %arg16[%c0_25, %c0_26], %72 {strides = array<i32>} : memref<8x32xbf16, #tpu.memory_space<vmem>>, vector<8x8xbf16>,
    %74 = vector.extract_strided_slice %40 {offsets = [0, 0, 8], sizes = [1, 8, 8], strides = [1, 1, 1]} : vector<1x8x32xbf16> to vector<1x8x8xbf16>
    %75 = vector.extract_strided_slice %43 {offsets = [0, 0, 8], sizes = [1, 8, 8], strides = [1, 1, 1]} : vector<1x8x32xbf16> to vector<1x8x8xbf16>
    "tpu.trace_start"() <{level = 10 : i32, message = "bqd,bkd->bqk"}> : () -> ()
    %cst_27 = arith.constant dense<0.000000e+00> : vector<1x8x8xf32>
    %76 = tpu.matmul %74, %75, %cst_27 {dimension_numbers = #tpu.dot_dimension_numbers<[2], [2], [1], [1], [0, 0, 0, 1, 1, 1], [0], [0]>} : vector<1x8x8xbf16>, vector<1x8x8xbf16>, vector<1x8x8xf32> -> vector<1x8x8xf32>
    "tpu.trace_stop"() : () -> ()
    %77 = vector.shape_cast %52 : vector<8x8xf32> to vector<1x8x8xf32>
    %78 = arith.addf %76, %77 : vector<1x8x8xf32>
    %cst_28 = arith.constant dense<0xFF800000> : vector<1x8xf32>
    %79 = vector.multi_reduction <maximumf>, %78, %cst_28 [2] : vector<1x8x8xf32> to vector<1x8xf32>
    %80 = vector.shape_cast %79 : vector<1x8xf32> to vector<1x8x1xf32>
    %81 = vector.broadcast %80 : vector<1x8x1xf32> to vector<1x8x8xf32>
    %82 = arith.subf %78, %81 : vector<1x8x8xf32>
    %83 = math.exp %82 : vector<1x8x8xf32>
    %cst_29 = arith.constant dense<0.000000e+00> : vector<1x8xf32>
    %84 = vector.multi_reduction <add>, %83, %cst_29 [2] : vector<1x8x8xf32> to vector<1x8xf32>
    %85 = vector.shape_cast %84 : vector<1x8xf32> to vector<1x8x1xf32>
    %86 = tpu.reciprocal %85 {approx = true} : vector<1x8x1xf32> -> vector<1x8x1xf32>
    %87 = vector.broadcast %86 : vector<1x8x1xf32> to vector<1x8x8xf32>
    %88 = arith.mulf %83, %87 : vector<1x8x8xf32>
    %89 = arith.truncf %88 : vector<1x8x8xf32> to vector<1x8x8xbf16>
    %90 = vector.extract_strided_slice %46 {offsets = [0, 0, 8], sizes = [1, 8, 8], strides = [1, 1, 1]} : vector<1x8x32xbf16> to vector<1x8x8xbf16>
    "tpu.trace_start"() <{level = 10 : i32, message = "bqk,bkd->bqd"}> : () -> ()
    %cst_30 = arith.constant dense<0.000000e+00> : vector<1x8x8xf32>
    %91 = tpu.matmul %89, %90, %cst_30 {dimension_numbers = #tpu.dot_dimension_numbers<[2], [1], [1], [2], [0, 0, 0, 1, 1, 2], [0], [0]>} : vector<1x8x8xbf16>, vector<1x8x8xbf16>, vector<1x8x8xf32> -> vector<1x8x8xf32>
    "tpu.trace_stop"() : () -> ()
    %92 = vector.shape_cast %91 : vector<1x8x8xf32> to vector<8x8xf32>
    %93 = arith.truncf %92 : vector<8x8xf32> to vector<8x8xbf16>
    %c0_31 = arith.constant 0 : index
    %c8 = arith.constant 8 : index
    %94 = vector.load %arg16[%c0_31, %c8] : memref<8x32xbf16, #tpu.memory_space<vmem>>, vector<8x8xbf16>
    tpu.vector_store %arg16[%c0_31, %c8], %93 {strides = array<i32>} : memref<8x32xbf16, #tpu.memory_space<vmem>>, vector<8x8xbf16>,
    %95 = vector.extract_strided_slice %40 {offsets = [0, 0, 16], sizes = [1, 8, 8], strides = [1, 1, 1]} : vector<1x8x32xbf16> to vector<1x8x8xbf16>
    %96 = vector.extract_strided_slice %43 {offsets = [0, 0, 16], sizes = [1, 8, 8], strides = [1, 1, 1]} : vector<1x8x32xbf16> to vector<1x8x8xbf16>
    "tpu.trace_start"() <{level = 10 : i32, message = "bqd,bkd->bqk"}> : () -> ()
    %cst_32 = arith.constant dense<0.000000e+00> : vector<1x8x8xf32>
    %97 = tpu.matmul %95, %96, %cst_32 {dimension_numbers = #tpu.dot_dimension_numbers<[2], [2], [1], [1], [0, 0, 0, 1, 1, 1], [0], [0]>} : vector<1x8x8xbf16>, vector<1x8x8xbf16>, vector<1x8x8xf32> -> vector<1x8x8xf32>
    "tpu.trace_stop"() : () -> ()
    %98 = vector.shape_cast %52 : vector<8x8xf32> to vector<1x8x8xf32>
    %99 = arith.addf %97, %98 : vector<1x8x8xf32>
    %cst_33 = arith.constant dense<0xFF800000> : vector<1x8xf32>
    %100 = vector.multi_reduction <maximumf>, %99, %cst_33 [2] : vector<1x8x8xf32> to vector<1x8xf32>
    %101 = vector.shape_cast %100 : vector<1x8xf32> to vector<1x8x1xf32>
    %102 = vector.broadcast %101 : vector<1x8x1xf32> to vector<1x8x8xf32>
    %103 = arith.subf %99, %102 : vector<1x8x8xf32>
    %104 = math.exp %103 : vector<1x8x8xf32>
    %cst_34 = arith.constant dense<0.000000e+00> : vector<1x8xf32>
    %105 = vector.multi_reduction <add>, %104, %cst_34 [2] : vector<1x8x8xf32> to vector<1x8xf32>
    %106 = vector.shape_cast %105 : vector<1x8xf32> to vector<1x8x1xf32>
    %107 = tpu.reciprocal %106 {approx = true} : vector<1x8x1xf32> -> vector<1x8x1xf32>
    %108 = vector.broadcast %107 : vector<1x8x1xf32> to vector<1x8x8xf32>
    %109 = arith.mulf %104, %108 : vector<1x8x8xf32>
    %110 = arith.truncf %109 : vector<1x8x8xf32> to vector<1x8x8xbf16>
    %111 = vector.extract_strided_slice %46 {offsets = [0, 0, 16], sizes = [1, 8, 8], strides = [1, 1, 1]} : vector<1x8x32xbf16> to vector<1x8x8xbf16>
    "tpu.trace_start"() <{level = 10 : i32, message = "bqk,bkd->bqd"}> : () -> ()
    %cst_35 = arith.constant dense<0.000000e+00> : vector<1x8x8xf32>
    %112 = tpu.matmul %110, %111, %cst_35 {dimension_numbers = #tpu.dot_dimension_numbers<[2], [1], [1], [2], [0, 0, 0, 1, 1, 2], [0], [0]>} : vector<1x8x8xbf16>, vector<1x8x8xbf16>, vector<1x8x8xf32> -> vector<1x8x8xf32>
    "tpu.trace_stop"() : () -> ()
    %113 = vector.shape_cast %112 : vector<1x8x8xf32> to vector<8x8xf32>
    %114 = arith.truncf %113 : vector<8x8xf32> to vector<8x8xbf16>
    %c0_36 = arith.constant 0 : index
    %c16 = arith.constant 16 : index
    %115 = vector.load %arg16[%c0_36, %c16] : memref<8x32xbf16, #tpu.memory_space<vmem>>, vector<8x8xbf16>
    tpu.vector_store %arg16[%c0_36, %c16], %114 {strides = array<i32>} : memref<8x32xbf16, #tpu.memory_space<vmem>>, vector<8x8xbf16>,
    %116 = vector.extract_strided_slice %40 {offsets = [0, 0, 24], sizes = [1, 8, 8], strides = [1, 1, 1]} : vector<1x8x32xbf16> to vector<1x8x8xbf16>
    %117 = vector.extract_strided_slice %43 {offsets = [0, 0, 24], sizes = [1, 8, 8], strides = [1, 1, 1]} : vector<1x8x32xbf16> to vector<1x8x8xbf16>
    "tpu.trace_start"() <{level = 10 : i32, message = "bqd,bkd->bqk"}> : () -> ()
    %cst_37 = arith.constant dense<0.000000e+00> : vector<1x8x8xf32>
    %118 = tpu.matmul %116, %117, %cst_37 {dimension_numbers = #tpu.dot_dimension_numbers<[2], [2], [1], [1], [0, 0, 0, 1, 1, 1], [0], [0]>} : vector<1x8x8xbf16>, vector<1x8x8xbf16>, vector<1x8x8xf32> -> vector<1x8x8xf32>
    "tpu.trace_stop"() : () -> ()
    %119 = vector.shape_cast %52 : vector<8x8xf32> to vector<1x8x8xf32>
    %120 = arith.addf %118, %119 : vector<1x8x8xf32>
    %cst_38 = arith.constant dense<0xFF800000> : vector<1x8xf32>
    %121 = vector.multi_reduction <maximumf>, %120, %cst_38 [2] : vector<1x8x8xf32> to vector<1x8xf32>
    %122 = vector.shape_cast %121 : vector<1x8xf32> to vector<1x8x1xf32>
    %123 = vector.broadcast %122 : vector<1x8x1xf32> to vector<1x8x8xf32>
    %124 = arith.subf %120, %123 : vector<1x8x8xf32>
    %125 = math.exp %124 : vector<1x8x8xf32>
    %cst_39 = arith.constant dense<0.000000e+00> : vector<1x8xf32>
    %126 = vector.multi_reduction <add>, %125, %cst_39 [2] : vector<1x8x8xf32> to vector<1x8xf32>
    %127 = vector.shape_cast %126 : vector<1x8xf32> to vector<1x8x1xf32>
    %128 = tpu.reciprocal %127 {approx = true} : vector<1x8x1xf32> -> vector<1x8x1xf32>
    %129 = vector.broadcast %128 : vector<1x8x1xf32> to vector<1x8x8xf32>
    %130 = arith.mulf %125, %129 : vector<1x8x8xf32>
    %131 = arith.truncf %130 : vector<1x8x8xf32> to vector<1x8x8xbf16>
    %132 = vector.extract_strided_slice %46 {offsets = [0, 0, 24], sizes = [1, 8, 8], strides = [1, 1, 1]} : vector<1x8x32xbf16> to vector<1x8x8xbf16>
    "tpu.trace_start"() <{level = 10 : i32, message = "bqk,bkd->bqd"}> : () -> ()
    %cst_40 = arith.constant dense<0.000000e+00> : vector<1x8x8xf32>
    %133 = tpu.matmul %131, %132, %cst_40 {dimension_numbers = #tpu.dot_dimension_numbers<[2], [1], [1], [2], [0, 0, 0, 1, 1, 2], [0], [0]>} : vector<1x8x8xbf16>, vector<1x8x8xbf16>, vector<1x8x8xf32> -> vector<1x8x8xf32>
    "tpu.trace_stop"() : () -> ()
    %134 = vector.shape_cast %133 : vector<1x8x8xf32> to vector<8x8xf32>
    %135 = arith.truncf %134 : vector<8x8xf32> to vector<8x8xbf16>
    %c0_41 = arith.constant 0 : index
    %c24 = arith.constant 24 : index
    %136 = vector.load %arg16[%c0_41, %c24] : memref<8x32xbf16, #tpu.memory_space<vmem>>, vector<8x8xbf16>
    tpu.vector_store %arg16[%c0_41, %c24], %135 {strides = array<i32>} : memref<8x32xbf16, #tpu.memory_space<vmem>>, vector<8x8xbf16>,
    %c0_42 = arith.constant 0 : index
    %c0_43 = arith.constant 0 : index
    %137 = vector.load %arg16[%c0_42, %c0_43] : memref<8x32xbf16, #tpu.memory_space<vmem>>, vector<8x32xbf16>
    %c0_44 = arith.constant 0 : index
    %c0_45 = arith.constant 0 : index
    %c0_46 = arith.constant 0 : index
    %138 = vector.load %arg7[%c0_44, %c0_45, %c0_46] : memref<1x32x32xbf16, #tpu.memory_space<vmem>>, vector<1x32x32xbf16>
    %139 = vector.shape_cast %138 : vector<1x32x32xbf16> to vector<32x32xbf16>
    %cst_47 = arith.constant dense<0.000000e+00> : vector<8x32xf32>
    %140 = tpu.matmul %137, %139, %cst_47 {dimension_numbers = #tpu.dot_dimension_numbers<[1], [0], [0], [1], [0, 0, 1, 1], [], []>} : vector<8x32xbf16>, vector<32x32xbf16>, vector<8x32xf32> -> vector<8x32xf32>
    %c0_48 = arith.constant 0 : index
    %c0_49 = arith.constant 0 : index
    %c0_50 = arith.constant 0 : index
    %141 = vector.load %arg8[%c0_48, %c0_49, %c0_50] : memref<1x1x32xf32, #tpu.memory_space<vmem>>, vector<1x1x32xf32>
    %142 = vector.shape_cast %141 : vector<1x1x32xf32> to vector<1x32xf32>
    %143 = vector.broadcast %142 : vector<1x32xf32> to vector<8x32xf32>
    %144 = arith.addf %140, %143 : vector<8x32xf32>
    %145 = arith.addf %3, %144 : vector<8x32xf32>
    %c0_51 = arith.constant 0 : index
    %c0_52 = arith.constant 0 : index
    %c0_53 = arith.constant 0 : index
    %146 = vector.load %arg9[%c0_51, %c0_52, %c0_53] : memref<1x1x32xf32, #tpu.memory_space<vmem>>, vector<1x1x32xf32>
    %147 = vector.shape_cast %146 : vector<1x1x32xf32> to vector<1x32xf32>
    %c0_54 = arith.constant 0 : index
    %c0_55 = arith.constant 0 : index
    %c0_56 = arith.constant 0 : index
    %148 = vector.load %arg10[%c0_54, %c0_55, %c0_56] : memref<1x1x32xf32, #tpu.memory_space<vmem>>, vector<1x1x32xf32>
    %149 = vector.shape_cast %148 : vector<1x1x32xf32> to vector<1x32xf32>
    %cst_57 = arith.constant dense<0.000000e+00> : vector<8xf32>
    %150 = vector.multi_reduction <add>, %145, %cst_57 [1] : vector<8x32xf32> to vector<8xf32>
    %151 = vector.shape_cast %150 : vector<8xf32> to vector<8x1xf32>
    %cst_58 = arith.constant 3.200000e+01 : f32
    %152 = vector.broadcast %cst_58 : f32 to vector<8x1xf32>
    %153 = arith.divf %151, %152 : vector<8x1xf32>
    %154 = vector.broadcast %153 : vector<8x1xf32> to vector<8x32xf32>
    %155 = arith.subf %145, %154 : vector<8x32xf32>
    %156 = arith.mulf %155, %155 : vector<8x32xf32>
    %cst_59 = arith.constant dense<0.000000e+00> : vector<8xf32>
    %157 = vector.multi_reduction <add>, %156, %cst_59 [1] : vector<8x32xf32> to vector<8xf32>
    %158 = vector.shape_cast %157 : vector<8xf32> to vector<8x1xf32>
    %cst_60 = arith.constant 3.200000e+01 : f32
    %159 = vector.broadcast %cst_60 : f32 to vector<8x1xf32>
    %160 = arith.divf %158, %159 : vector<8x1xf32>
    %161 = vector.broadcast %153 : vector<8x1xf32> to vector<8x32xf32>
    %162 = arith.subf %145, %161 : vector<8x32xf32>
    %cst_61 = arith.constant 9.99999974E-6 : f32
    %163 = vector.broadcast %cst_61 : f32 to vector<8x1xf32>
    %164 = arith.addf %160, %163 : vector<8x1xf32>
    %165 = math.rsqrt %164 : vector<8x1xf32>
    %166 = vector.broadcast %165 : vector<8x1xf32> to vector<8x32xf32>
    %167 = arith.mulf %162, %166 : vector<8x32xf32>
    %168 = vector.broadcast %147 : vector<1x32xf32> to vector<8x32xf32>
    %169 = arith.mulf %167, %168 : vector<8x32xf32>
    %170 = vector.broadcast %149 : vector<1x32xf32> to vector<8x32xf32>
    %171 = arith.addf %169, %170 : vector<8x32xf32>
    %172 = arith.truncf %171 : vector<8x32xf32> to vector<8x32xbf16>
    %cst_62 = arith.constant 0.000000e+00 : f32
    %173 = vector.broadcast %cst_62 : f32 to vector<8x32xf32>
    %c0_63 = arith.constant 0 : index
    %c0_64 = arith.constant 0 : index
    %c0_65 = arith.constant 0 : index
    %174 = vector.load %arg11[%c0_63, %c0_64, %c0_65] : memref<1x32x128xbf16, #tpu.memory_space<vmem>>, vector<1x32x32xbf16>
    %175 = vector.shape_cast %174 : vector<1x32x32xbf16> to vector<32x32xbf16>
    %cst_66 = arith.constant dense<0.000000e+00> : vector<8x32xf32>
    %176 = tpu.matmul %172, %175, %cst_66 {dimension_numbers = #tpu.dot_dimension_numbers<[1], [0], [0], [1], [0, 0, 1, 1], [], []>} : vector<8x32xbf16>, vector<32x32xbf16>, vector<8x32xf32> -> vector<8x32xf32>
    %c0_67 = arith.constant 0 : index
    %c0_68 = arith.constant 0 : index
    %c0_69 = arith.constant 0 : index
    %177 = vector.load %arg12[%c0_67, %c0_68, %c0_69] : memref<1x1x128xf32, #tpu.memory_space<vmem>>, vector<1x1x32xf32>
    %178 = vector.shape_cast %177 : vector<1x1x32xf32> to vector<1x32xf32>
    %179 = vector.broadcast %178 : vector<1x32xf32> to vector<8x32xf32>
    %180 = arith.addf %176, %179 : vector<8x32xf32>
    %cst_70 = arith.constant 1.702000e+00 : f32
    %181 = vector.broadcast %cst_70 : f32 to vector<8x32xf32>
    %182 = arith.mulf %181, %180 : vector<8x32xf32>
    %183 = arith.negf %182 : vector<8x32xf32>
    %184 = math.exp %183 : vector<8x32xf32>
    %cst_71 = arith.constant 1.000000e+00 : f32
    %185 = vector.broadcast %cst_71 : f32 to vector<8x32xf32>
    %186 = arith.addf %185, %184 : vector<8x32xf32>
    %187 = arith.divf %185, %186 : vector<8x32xf32>
    %188 = arith.mulf %180, %187 : vector<8x32xf32>
    %189 = arith.truncf %188 : vector<8x32xf32> to vector<8x32xbf16>
    %c0_72 = arith.constant 0 : index
    %c0_73 = arith.constant 0 : index
    %c0_74 = arith.constant 0 : index
    %190 = vector.load %arg13[%c0_72, %c0_73, %c0_74] : memref<1x128x32xbf16, #tpu.memory_space<vmem>>, vector<1x32x32xbf16>
    %191 = vector.shape_cast %190 : vector<1x32x32xbf16> to vector<32x32xbf16>
    %cst_75 = arith.constant dense<0.000000e+00> : vector<8x32xf32>
    %192 = tpu.matmul %189, %191, %cst_75 {dimension_numbers = #tpu.dot_dimension_numbers<[1], [0], [0], [1], [0, 0, 1, 1], [], []>} : vector<8x32xbf16>, vector<32x32xbf16>, vector<8x32xf32> -> vector<8x32xf32>
    %193 = arith.addf %173, %192 : vector<8x32xf32>
    %c0_76 = arith.constant 0 : index
    %c0_77 = arith.constant 0 : index
    %c32 = arith.constant 32 : index
    %194 = vector.load %arg11[%c0_76, %c0_77, %c32] : memref<1x32x128xbf16, #tpu.memory_space<vmem>>, vector<1x32x32xbf16>
    %195 = vector.shape_cast %194 : vector<1x32x32xbf16> to vector<32x32xbf16>
    %cst_78 = arith.constant dense<0.000000e+00> : vector<8x32xf32>
    %196 = tpu.matmul %172, %195, %cst_78 {dimension_numbers = #tpu.dot_dimension_numbers<[1], [0], [0], [1], [0, 0, 1, 1], [], []>} : vector<8x32xbf16>, vector<32x32xbf16>, vector<8x32xf32> -> vector<8x32xf32>
    %c0_79 = arith.constant 0 : index
    %c0_80 = arith.constant 0 : index
    %c32_81 = arith.constant 32 : index
    %197 = vector.load %arg12[%c0_79, %c0_80, %c32_81] : memref<1x1x128xf32, #tpu.memory_space<vmem>>, vector<1x1x32xf32>
    %198 = vector.shape_cast %197 : vector<1x1x32xf32> to vector<1x32xf32>
    %199 = vector.broadcast %198 : vector<1x32xf32> to vector<8x32xf32>
    %200 = arith.addf %196, %199 : vector<8x32xf32>
    %cst_82 = arith.constant 1.702000e+00 : f32
    %201 = vector.broadcast %cst_82 : f32 to vector<8x32xf32>
    %202 = arith.mulf %201, %200 : vector<8x32xf32>
    %203 = arith.negf %202 : vector<8x32xf32>
    %204 = math.exp %203 : vector<8x32xf32>
    %cst_83 = arith.constant 1.000000e+00 : f32
    %205 = vector.broadcast %cst_83 : f32 to vector<8x32xf32>
    %206 = arith.addf %205, %204 : vector<8x32xf32>
    %207 = arith.divf %205, %206 : vector<8x32xf32>
    %208 = arith.mulf %200, %207 : vector<8x32xf32>
    %209 = arith.truncf %208 : vector<8x32xf32> to vector<8x32xbf16>
    %c0_84 = arith.constant 0 : index
    %c32_85 = arith.constant 32 : index
    %c0_86 = arith.constant 0 : index
    %210 = vector.load %arg13[%c0_84, %c32_85, %c0_86] : memref<1x128x32xbf16, #tpu.memory_space<vmem>>, vector<1x32x32xbf16>
    %211 = vector.shape_cast %210 : vector<1x32x32xbf16> to vector<32x32xbf16>
    %cst_87 = arith.constant dense<0.000000e+00> : vector<8x32xf32>
    %212 = tpu.matmul %209, %211, %cst_87 {dimension_numbers = #tpu.dot_dimension_numbers<[1], [0], [0], [1], [0, 0, 1, 1], [], []>} : vector<8x32xbf16>, vector<32x32xbf16>, vector<8x32xf32> -> vector<8x32xf32>
    %213 = arith.addf %193, %212 : vector<8x32xf32>
    %c0_88 = arith.constant 0 : index
    %c0_89 = arith.constant 0 : index
    %c64 = arith.constant 64 : index
    %214 = vector.load %arg11[%c0_88, %c0_89, %c64] : memref<1x32x128xbf16, #tpu.memory_space<vmem>>, vector<1x32x32xbf16>
    %215 = vector.shape_cast %214 : vector<1x32x32xbf16> to vector<32x32xbf16>
    %cst_90 = arith.constant dense<0.000000e+00> : vector<8x32xf32>
    %216 = tpu.matmul %172, %215, %cst_90 {dimension_numbers = #tpu.dot_dimension_numbers<[1], [0], [0], [1], [0, 0, 1, 1], [], []>} : vector<8x32xbf16>, vector<32x32xbf16>, vector<8x32xf32> -> vector<8x32xf32>
    %c0_91 = arith.constant 0 : index
    %c0_92 = arith.constant 0 : index
    %c64_93 = arith.constant 64 : index
    %217 = vector.load %arg12[%c0_91, %c0_92, %c64_93] : memref<1x1x128xf32, #tpu.memory_space<vmem>>, vector<1x1x32xf32>
    %218 = vector.shape_cast %217 : vector<1x1x32xf32> to vector<1x32xf32>
    %219 = vector.broadcast %218 : vector<1x32xf32> to vector<8x32xf32>
    %220 = arith.addf %216, %219 : vector<8x32xf32>
    %cst_94 = arith.constant 1.702000e+00 : f32
    %221 = vector.broadcast %cst_94 : f32 to vector<8x32xf32>
    %222 = arith.mulf %221, %220 : vector<8x32xf32>
    %223 = arith.negf %222 : vector<8x32xf32>
    %224 = math.exp %223 : vector<8x32xf32>
    %cst_95 = arith.constant 1.000000e+00 : f32
    %225 = vector.broadcast %cst_95 : f32 to vector<8x32xf32>
    %226 = arith.addf %225, %224 : vector<8x32xf32>
    %227 = arith.divf %225, %226 : vector<8x32xf32>
    %228 = arith.mulf %220, %227 : vector<8x32xf32>
    %229 = arith.truncf %228 : vector<8x32xf32> to vector<8x32xbf16>
    %c0_96 = arith.constant 0 : index
    %c64_97 = arith.constant 64 : index
    %c0_98 = arith.constant 0 : index
    %230 = vector.load %arg13[%c0_96, %c64_97, %c0_98] : memref<1x128x32xbf16, #tpu.memory_space<vmem>>, vector<1x32x32xbf16>
    %231 = vector.shape_cast %230 : vector<1x32x32xbf16> to vector<32x32xbf16>
    %cst_99 = arith.constant dense<0.000000e+00> : vector<8x32xf32>
    %232 = tpu.matmul %229, %231, %cst_99 {dimension_numbers = #tpu.dot_dimension_numbers<[1], [0], [0], [1], [0, 0, 1, 1], [], []>} : vector<8x32xbf16>, vector<32x32xbf16>, vector<8x32xf32> -> vector<8x32xf32>
    %233 = arith.addf %213, %232 : vector<8x32xf32>
    %c0_100 = arith.constant 0 : index
    %c0_101 = arith.constant 0 : index
    %c96 = arith.constant 96 : index
    %234 = vector.load %arg11[%c0_100, %c0_101, %c96] : memref<1x32x128xbf16, #tpu.memory_space<vmem>>, vector<1x32x32xbf16>
    %235 = vector.shape_cast %234 : vector<1x32x32xbf16> to vector<32x32xbf16>
    %cst_102 = arith.constant dense<0.000000e+00> : vector<8x32xf32>
    %236 = tpu.matmul %172, %235, %cst_102 {dimension_numbers = #tpu.dot_dimension_numbers<[1], [0], [0], [1], [0, 0, 1, 1], [], []>} : vector<8x32xbf16>, vector<32x32xbf16>, vector<8x32xf32> -> vector<8x32xf32>
    %c0_103 = arith.constant 0 : index
    %c0_104 = arith.constant 0 : index
    %c96_105 = arith.constant 96 : index
    %237 = vector.load %arg12[%c0_103, %c0_104, %c96_105] : memref<1x1x128xf32, #tpu.memory_space<vmem>>, vector<1x1x32xf32>
    %238 = vector.shape_cast %237 : vector<1x1x32xf32> to vector<1x32xf32>
    %239 = vector.broadcast %238 : vector<1x32xf32> to vector<8x32xf32>
    %240 = arith.addf %236, %239 : vector<8x32xf32>
    %cst_106 = arith.constant 1.702000e+00 : f32
    %241 = vector.broadcast %cst_106 : f32 to vector<8x32xf32>
    %242 = arith.mulf %241, %240 : vector<8x32xf32>
    %243 = arith.negf %242 : vector<8x32xf32>
    %244 = math.exp %243 : vector<8x32xf32>
    %cst_107 = arith.constant 1.000000e+00 : f32
    %245 = vector.broadcast %cst_107 : f32 to vector<8x32xf32>
    %246 = arith.addf %245, %244 : vector<8x32xf32>
    %247 = arith.divf %245, %246 : vector<8x32xf32>
    %248 = arith.mulf %240, %247 : vector<8x32xf32>
    %249 = arith.truncf %248 : vector<8x32xf32> to vector<8x32xbf16>
    %c0_108 = arith.constant 0 : index
    %c96_109 = arith.constant 96 : index
    %c0_110 = arith.constant 0 : index
    %250 = vector.load %arg13[%c0_108, %c96_109, %c0_110] : memref<1x128x32xbf16, #tpu.memory_space<vmem>>, vector<1x32x32xbf16>
    %251 = vector.shape_cast %250 : vector<1x32x32xbf16> to vector<32x32xbf16>
    %cst_111 = arith.constant dense<0.000000e+00> : vector<8x32xf32>
    %252 = tpu.matmul %249, %251, %cst_111 {dimension_numbers = #tpu.dot_dimension_numbers<[1], [0], [0], [1], [0, 0, 1, 1], [], []>} : vector<8x32xbf16>, vector<32x32xbf16>, vector<8x32xf32> -> vector<8x32xf32>
    %253 = arith.addf %233, %252 : vector<8x32xf32>
    %254 = arith.addf %145, %253 : vector<8x32xf32>
    %c0_112 = arith.constant 0 : index
    %c0_113 = arith.constant 0 : index
    %c0_114 = arith.constant 0 : index
    %255 = vector.load %arg14[%c0_112, %c0_113, %c0_114] : memref<1x1x32xf32, #tpu.memory_space<vmem>>, vector<1x1x32xf32>
    %256 = vector.shape_cast %255 : vector<1x1x32xf32> to vector<1x32xf32>
    %257 = vector.broadcast %256 : vector<1x32xf32> to vector<8x32xf32>
    %258 = arith.addf %254, %257 : vector<8x32xf32>
    %c0_115 = arith.constant 0 : index
    %c0_116 = arith.constant 0 : index
    %259 = vector.load %arg15[%c0_115, %c0_116] : memref<8x32xf32, #tpu.memory_space<vmem>>, vector<8x32xf32>
    tpu.vector_store %arg15[%c0_115, %c0_116], %258 {strides = array<i32>} : memref<8x32xf32, #tpu.memory_space<vmem>>, vector<8x32xf32>,
    return
  }
  func.func @transform_0(%arg0: i32, %arg1: i32) -> (i32, i32) {
    %c0_i32 = arith.constant 0 : i32
    %c0_i32_0 = arith.constant 0 : i32
    return %arg0, %c0_i32 : i32, i32
  }
  func.func @transform_1(%arg0: i32, %arg1: i32) -> (i32, i32, i32) {
    %c0_i32 = arith.constant 0 : i32
    %c0_i32_0 = arith.constant 0 : i32
    %c0_i32_1 = arith.constant 0 : i32
    return %arg1, %c0_i32, %c0_i32_0 : i32, i32, i32
  }
  func.func @transform_2(%arg0: i32, %arg1: i32) -> (i32, i32, i32) {
    %c0_i32 = arith.constant 0 : i32
    %c0_i32_0 = arith.constant 0 : i32
    %c0_i32_1 = arith.constant 0 : i32
    return %arg1, %c0_i32, %c0_i32_0 : i32, i32, i32
  }
  func.func @transform_3(%arg0: i32, %arg1: i32) -> (i32, i32, i32) {
    %c0_i32 = arith.constant 0 : i32
    %c0_i32_0 = arith.constant 0 : i32
    %c0_i32_1 = arith.constant 0 : i32
    return %arg1, %c0_i32, %c0_i32_0 : i32, i32, i32
  }
  func.func @transform_4(%arg0: i32, %arg1: i32) -> (i32, i32, i32) {
    %c0_i32 = arith.constant 0 : i32
    %c0_i32_0 = arith.constant 0 : i32
    %c0_i32_1 = arith.constant 0 : i32
    return %arg1, %c0_i32, %c0_i32_0 : i32, i32, i32
  }
  func.func @transform_5(%arg0: i32, %arg1: i32) -> (i32, i32, i32) {
    %c0_i32 = arith.constant 0 : i32
    %c0_i32_0 = arith.constant 0 : i32
    %c0_i32_1 = arith.constant 0 : i32
    return %arg1, %c0_i32, %c0_i32_0 : i32, i32, i32
  }
  func.func @transform_6(%arg0: i32, %arg1: i32) -> (i32, i32, i32) {
    %c0_i32 = arith.constant 0 : i32
    %c0_i32_0 = arith.constant 0 : i32
    %c0_i32_1 = arith.constant 0 : i32
    return %arg1, %c0_i32, %c0_i32_0 : i32, i32, i32
  }
  func.func @transform_7(%arg0: i32, %arg1: i32) -> (i32, i32, i32) {
    %c0_i32 = arith.constant 0 : i32
    %c0_i32_0 = arith.constant 0 : i32
    %c0_i32_1 = arith.constant 0 : i32
    return %arg1, %c0_i32, %c0_i32_0 : i32, i32, i32
  }
  func.func @transform_8(%arg0: i32, %arg1: i32) -> (i32, i32, i32) {
    %c0_i32 = arith.constant 0 : i32
    %c0_i32_0 = arith.constant 0 : i32
    %c0_i32_1 = arith.constant 0 : i32
    return %arg1, %c0_i32, %c0_i32_0 : i32, i32, i32
  }
  func.func @transform_9(%arg0: i32, %arg1: i32) -> (i32, i32, i32) {
    %c0_i32 = arith.constant 0 : i32
    %c0_i32_0 = arith.constant 0 : i32
    %c0_i32_1 = arith.constant 0 : i32
    return %arg1, %c0_i32, %c0_i32_0 : i32, i32, i32
  }
  func.func @transform_10(%arg0: i32, %arg1: i32) -> (i32, i32, i32) {
    %c0_i32 = arith.constant 0 : i32
    %c0_i32_0 = arith.constant 0 : i32
    %c0_i32_1 = arith.constant 0 : i32
    return %arg1, %c0_i32, %c0_i32_0 : i32, i32, i32
  }
  func.func @transform_11(%arg0: i32, %arg1: i32) -> (i32, i32, i32) {
    %c0_i32 = arith.constant 0 : i32
    %c0_i32_0 = arith.constant 0 : i32
    %c0_i32_1 = arith.constant 0 : i32
    return %arg1, %c0_i32, %c0_i32_0 : i32, i32, i32
  }
  func.func @transform_12(%arg0: i32, %arg1: i32) -> (i32, i32, i32) {
    %c0_i32 = arith.constant 0 : i32
    %c0_i32_0 = arith.constant 0 : i32
    %c0_i32_1 = arith.constant 0 : i32
    return %arg1, %c0_i32, %c0_i32_0 : i32, i32, i32
  }
  func.func @transform_13(%arg0: i32, %arg1: i32) -> (i32, i32) {
    %c0_i32 = arith.constant 0 : i32
    %c0_i32_0 = arith.constant 0 : i32
    return %arg0, %c0_i32 : i32, i32
  }
}

</mosaic_0001>

<bundles_post_ra>
// kernel: text_encoder_forward.1
= control target key start
LH: loop header
LB: loop body
LE: loop exit
PB: predicated region body
PF: predicated region fallthrough
CT: control target
= control target key end

     0   :  { %s2486_s25 = smov 0   ;;  %s2488_s26 = smov 0   ;;  %s2798_s0 = inlined_call_operand.vmem [shape: f32[16,32], index: 0, kind: input, shape index: {}, may-alias: {0,13}]   ;;  %s2799_s1 = inlined_call_operand.vmem [shape: f32[2,1,32], index: 1, kind: input, shape index: {}]   ;;  %s2800_s2 = inlined_call_operand.vmem [shape: f32[2,1,32], index: 2, kind: input, shape index: {}]   ;;  %s2801_s3 = inlined_call_operand.vmem [shape: bf16[2,32,96], index: 3, kind: input, shape index: {}]   ;;  %s2802_s4 = inlined_call_operand.vmem [shape: f32[2,1,96], index: 4, kind: input, shape index: {}]   ;;  %s2803_s5 = inlined_call_operand.vmem [shape: bf16[2,32,32], index: 5, kind: input, shape index: {}]   ;;  %s2804_s6 = inlined_call_operand.vmem [shape: f32[2,1,32], index: 6, kind: input, shape index: {}]   ;;  %s2805_s7 = inlined_call_operand.vmem [shape: f32[2,1,32], index: 7, kind: input, shape index: {}]   ;;  %s2806_s8 = inlined_call_operand.vmem [shape: f32[2,1,32], index: 8, kind: input, shape index: {}]   ;;  %s2807_s9 = inlined_call_operand.vmem [shape: bf16[2,32,128], index: 9, kind: input, shape index: {}]   ;;  %s2808_s10 = inlined_call_operand.vmem [shape: f32[2,1,128], index: 10, kind: input, shape index: {}]   ;;  %s2809_s11 = inlined_call_operand.vmem [shape: bf16[2,128,32], index: 11, kind: input, shape index: {}]   ;;  %s2810_s12 = inlined_call_operand.vmem [shape: f32[2,1,32], index: 12, kind: input, shape index: {}]   ;;  %s2811_s13 = inlined_call_operand.vmem [shape: f32[16,32], index: 13, kind: output, shape index: {}, may-alias: {0,13}]  }
   0x1   :  { %2816 = sst [smem:[#allocation9_spill]] %s2798_s0  ;;  %s2490_s27 = smov 0  }
   0x2   :  { %2817 = sst [smem:[#allocation10_spill]] %s2800_s2  ;;  %s2492_s28 = smov 0  }
   0x3   :  { %2818 = sst [smem:[#allocation11_spill]] %s2801_s3  ;;  %s2494_s29 = smov 0  }
   0x4   :  { %2819 = sst [smem:[#allocation12_spill]] %s2803_s5 }
   0x5   :  { %2820 = sst [smem:[#allocation13_spill]] %s2811_s13 }
   0x6 LB: > { %2821 = sst [smem:[#allocation3_spill]] %s2380_s25  ;;  %s32_s30 = sadd.s32 1, %s2388_s27  ;;  %s2396_s29 = sphi %s2494_s29, %s23_s29   ;;  %s2392_s28 = sphi %s2492_s28, %s2844_s28   ;;  %s2388_s27 = sphi %s2490_s27, %s2843_s27   ;;  %s2384_s26 = sphi %s2488_s26, %s2842_s26   ;;  %s2380_s25 = sphi %s2486_s25, %s2841_s25  }
   0x7   : > { %2822 = sst [smem:[#allocation4_spill]] %s2388_s27  ;;  %s35_s14 = sadd.s32 1, %s2392_s28 }
   0x8   : > { %2823 = sst [smem:[#allocation5_spill]] %s2392_s28  ;;  %p33_p0 = scmp.ge.s32.totalorder %s32_s30, 2 }
   0x9   : > { %2824 = sst [smem:[#allocation6_spill]] %s2396_s29  ;;  %p2008_p1 = scmp.ge.s32.totalorder %s2396_s29, 1 }
   0xa   : > { %p502_p2 = scmp.lt.s32.totalorder %s2396_s29, 5  ;;  %s2846_s30 = smov (%p33_p0, %s32_s30), 0 }
   0xb   : > { %2825 = sst [smem:[#allocation7_spill]] %s2846_s30  ;;  %s2848_s14 = smov (!%p33_p0, %s35_s14), %s2392_s28 }
   0xc   : > { %p503_p3 = pnand %p2008_p1, %p502_p2  ;;  %p37_p4 = scmp.ge.s32.totalorder %s2848_s14, 2 }
   0xd   : > { %p588_p5 = scmp.lt.s32.totalorder (!%p503_p3), %s2384_s26, 1  ;;  %p592_p6 = scmp.lt.s32.totalorder (!%p503_p3), %s2380_s25, 1 }
   0xe   : > { %s2850_s14 = smov (%p37_p4, %s2848_s14), 0  ;;  %506 = sbr.rel (%p503_p3) target bundleno = 2886 (0xb46), region = 72 }
   0xf   : > { %2826 = sst [smem:[#allocation8_spill]] %s2850_s14  ;;  %s2827_s0 = sld [smem:[#allocation9_spill]] (!%p503_p3) }
  0x10   : > { %s2829_s3 = sld [smem:[#allocation11_spill]] (!%p503_p3)  ;;  %s2830_s5 = sld [smem:[#allocation12_spill]] (!%p503_p3) }
  0x15   : > { %s2852_s26 = smov (!%p588_p5, %s2384_s26), 1 }
  0x16   : > { %s2520_s15 = scalar_select %p592_p6, %s2380_s25, 1 }
  0x17   : > { %s2009_s16 = sshll.u32 %s2852_s26, 3 }
  0x18   : > { %s591_s19 = scalar_lea.vmem %s2827_s0, %s2009_s16  ;;  %s2069_s30 = sshll.u32 %s2520_s15, 4 }
  0x19   : > { %s2537_s29 = scalar_lea.vmem %s2829_s3, %s2069_s30  ;;  %s2546_s0 = scalar_lea.vmem %s2830_s5, %s2069_s30 }
  0x1a   : > { %s2563_s26 = scalar_lea.vmem %s2807_s9, %s2069_s30  ;;  %s627_s13 = scalar_lea.vmem %s2808_s10, %s2520_s15 }
  0x1b   : > { %s2072_s5 = sshll.u32 %s2520_s15, 6  ;;  %s635_s23 = scalar_lea.vmem %s2810_s12, %s2520_s15 }
  0x1c   : > { %s2577_s22 = scalar_lea.vmem %s2809_s11, %s2072_s5  ;;  %s2831_s3 = sld [smem:[#allocation13_spill]] }
  0x1d   : > { %s2832_s30 = sld [smem:[#allocation3_spill]] }
  0x22   : > { %s2582_s2 = scalar_lea.vmem %s2831_s3, %s2009_s16 }
  0x23   : > { %p2019_p7 = scmp.ne.s32.totalorder %s2832_s30, 0 }
  0x24   : > { %v645_v0 = vld [vmem:[%s591_s19] sm:$0xff] (!%p2019_p7)  ;;  %vm646_vm0 = vcmask (!%p2019_p7), 261120  }
  0x25   : > { %644 = sbr.rel (%p2019_p7) target bundleno = 44 (0x2c), region = 76  ;;  %647 = vst.msk [vmem:[%s2582_s2] sm:$0xff] (!%p2019_p7), %vm646_vm0, %v645_v0 }
  0x2c PF: > { %v2587_v1 = vld [vmem:[%s2582_s2] sm:$0xff]  ;;  %vm651_vm1 = vcmask 261120   ;;  %v2398_v9 = vmov 0.0   ;;  %vm2399_vm2 = vmmov 0   ;;  %v2309_v10 = vld [vmem:[%s2537_s29 + $0x8] sm:$0xff]   ;;  %s2834_s25 = sld [smem:[#allocation10_spill]]  ;;  %s2836_s21 = scalar_lea.vmem %s2802_s4, %s2520_s15  ;;  %v748_v39 = vlaneseq }
  0x2d   : > { %v652_v2 = vsel %vm651_vm1, %v2587_v1, 0.0  ;;  %v2308_v8 = vld [vmem:[%s2537_s29] sm:$0xff]   ;;  %2122 = vmatprep.subr.bf16.mxu0 %v2398_v9  ;;  %2126 = vmatprep.mubr.msk.bf16.mxu0 %vm2399_vm2, %v2398_v9  ;;  %s2833_s29 = scalar_lea.vmem %s2799_s1, %s2520_s15  ;;  %s2400_s14 = smov 120   ;;  %vm757_vm3 = vcmask 64512   ;;  %v2407_v42 = vmov -1e+30  }
  0x2e   : > { %653 = vadd.xlane.f32.xlu0 %v652_v2  ;;  %2123 = vmatpush3.bf16.msra.mxu0 %v2308_v8  ;;  %v2020_v15 = vld [vmem:[%s2833_s29] ss:$0 sm:$0xff]  ;;  %s2401_s24 = smov 96   ;;  %s2402_s27 = smov 88   ;;  %v749_v40 = vshrl.u32 %v748_v39, 7  ;;  %v751_v41 = vand.u32 127, %v748_v39 }
  0x2f   : > { %2130 = vmatprep.subr.bf16.mxu1 %v2398_v9  ;;  %2124 = vmatprep.subr.bf16.mxu0 %v2398_v9  ;;  %v2022_v21 = vld [vmem:[%s2836_s21] ss:$0 sm:$0xff]  ;;  %s2403_s28 = smov 80   ;;  %s2404_s30 = smov 112   ;;  %vm821_vm5 = vcmask 1043456   ;;  %vm866_vm6 = vcmask 60416  }
  0x30   : > { %2132 = vmatprep.mubr.msk.bf16.mxu1 %vm2399_vm2, %v2398_v9  ;;  %s2405_s3 = smov 72   ;;  %s2406_s5 = smov 104   ;;  %vm752_vm4 = vcmp.ge.s32.totalorder %v749_v40, %v751_v41  ;;  %vm985_vm7 = vcmask 126016   ;;  %vm1104_vm8 = vcmask 191616   ;;  %vm1223_vm9 = vcmask 257216  }
  0x31   : > { %v753_v43 = vsel %vm752_vm4, 0.0, %v2407_v42  ;;  %s2408_s29 = smov 64   ;;  %s2409_s16 = smov 56  }
  0x32   : > { %2125 = vmatpush3.bf16.msra.mxu0 %v2309_v10  ;;  %s2835_s17 = scalar_lea.vmem %s2834_s25, %s2520_s15  ;;  %s2410_s19 = smov 48  }
  0x33   : > { %2136 = vmatprep.subr.bf16.mxu0 %v2398_v9  ;;  %v2021_v17 = vld [vmem:[%s2835_s17] ss:$0 sm:$0xff]  ;;  %s2411_s25 = smov 40   ;;  %s2412_s17 = smov 8  }
  0x34   : > { %s2413_s18 = smov 16   ;;  %s2414_s20 = smov 24  }
  0xbb   : > { %v654_v3 = vpop.xlane.xlu0 %653 }
  0xbc   : > { %v656_v4 = vmul.f32 0.03125, %v654_v3 }
  0xbe   : > { %v657_v5 = vsub.f32 %v2587_v1, %v656_v4 }
  0xc0   : > { %v658_v6 = vmul.f32 %v657_v5, %v657_v5 }
  0xc2   : > { %v659_v7 = vsel %vm651_vm1, %v658_v6, 0.0 }
  0xc3   : > { %660 = vadd.xlane.f32.xlu0 %v659_v7 }
 0x150   : > { %v661_v11 = vpop.xlane.xlu0 %660 }
 0x151   : > { %v662_v12 = vmul.f32 0.03125, %v661_v11 }
 0x153   : > { %v663_v13 = vadd.f32 1e-05, %v662_v12 }
 0x155   : > { %2322 = vrsqrt.f32 %v663_v13 }
 0x15f   : > { %v2323_v14 = vpop.eup %2322 }
 0x160   : > { %v665_v16 = vmul.f32 %v2323_v14, %v657_v5 }
 0x162   : > { %v672_v18 = vmul.f32 %v2020_v15, %v665_v16 }
 0x164   : > { %v679_v19 = vadd.f32 %v2021_v17, %v672_v18 }
 0x166   : > { %v680_v20 = vpack.c.bf16 %v679_v19, %v679_v19 }
 0x168   : > { %2127 = vmatmul.mubr.msk.bf16.vlgmr.msra.gmra.mrb[0].mxu0 %vm651_vm1, %v680_v20 }
 0x169   : > { %2138 = vmatprep.mubr.msk.bf16.mxu0 %vm2399_vm2, %v2398_v9 }
 0x23b   : > { %v741_v22 = vpop.f32.mrb[0].mxu0 }
 0x23c   : > { %v742_v23 = vadd.f32 %v2022_v21, %v741_v22  ;;  %v2128_v24 = vpop.f32.mrb[1].mxu0 }
 0x23d   : > { %v744_v25 = vpop.f32.mrb[2].mxu0 }
 0x23e   : > { %v2621_v26 = vpack.c.bf16 %v742_v23, %v742_v23  ;;  %v2129_v27 = vpop.f32.mrb[3].mxu0 }
 0x240   : > { %868 = vrot.lane.b32.xlu0 %v2621_v26, %s2400_s14  ;;  %755 = vrot.lane.b32.xlu1 %v2621_v26, %s2401_s24  ;;  %s2837_s14 = scalar_lea.vmem %s2804_s6, %s2520_s15 }
 0x244   : > { %870 = vrot.lane.b32.xlu1 %v2621_v26, %s2402_s27 }
 0x248   : > { %989 = vrot.lane.b32.xlu1 %v2621_v26, %s2403_s28 }
 0x24c   : > { %987 = vrot.lane.b32.xlu1 %v2621_v26, %s2404_s30  ;;  %s2838_s30 = scalar_lea.vmem %s2805_s7, %s2520_s15 }
 0x250   : > { %1108 = vrot.lane.b32.xlu1 %v2621_v26, %s2405_s3 }
 0x254   : > { %1106 = vrot.lane.b32.xlu1 %v2621_v26, %s2406_s5 }
 0x2b2   : > { %v756_v28 = vpop.permute.xlu1 %755  ;;  %v869_v33 = vpop.permute.xlu0 %868 }
 0x2b3   : > { %v762_v29 = vsel %vm757_vm3, %v756_v28, 0 }
 0x2b4   : > { %2131 = vmatpush3.bf16.xpose.msra.mxu1 %v762_v29 }
 0x2b5   : > { %2142 = vmatprep.subr.bf16.mxu1 %v2398_v9 }
 0x2b6   : > { %v871_v30 = vpop.permute.xlu1 %870 }
 0x2b7   : > { %v876_v31 = vsel %vm757_vm3, %v871_v30, 0 }
 0x2ba   : > { %v990_v32 = vpop.permute.xlu1 %989 }
 0x2bb   : > { %2133 = vmatmul.mubr.msk.bf16.vlgmr.msra.gmra.mrb[0].mxu1 %vm757_vm3, %v2621_v26  ;;  %v995_v35 = vsel %vm757_vm3, %v990_v32, 0 }
 0x2bc   : > { %2143 = vmatpush3.bf16.xpose.msra.mxu1 %v876_v31  ;;  %2144 = vmatprep.mubr.msk.bf16.mxu1 %vm2399_vm2, %v2398_v9 }
 0x2bd   : > { %2154 = vmatprep.subr.bf16.mxu1 %v2398_v9 }
 0x2be   : > { %v988_v34 = vpop.permute.xlu1 %987 }
 0x2c2   : > { %v1109_v36 = vpop.permute.xlu1 %1108 }
 0x2c3   : > { %2145 = vmatmul.mubr.msk.bf16.vlgmr.msra.gmra.mrb[4].mxu1 %vm757_vm3, %v869_v33  ;;  %v1114_v37 = vsel %vm757_vm3, %v1109_v36, 0 }
 0x2c4   : > { %2155 = vmatpush3.bf16.xpose.msra.mxu1 %v995_v35  ;;  %2156 = vmatprep.mubr.msk.bf16.mxu1 %vm2399_vm2, %v2398_v9 }
 0x2c5   : > { %2166 = vmatprep.subr.bf16.mxu1 %v2398_v9 }
 0x2c6   : > { %v1107_v38 = vpop.permute.xlu1 %1106 }
 0x2cb   : > { %2157 = vmatmul.mubr.msk.bf16.vlgmr.msra.gmra.mrb[8].mxu1 %vm757_vm3, %v988_v34 }
 0x2cc   : > { %2167 = vmatpush3.bf16.xpose.msra.mxu1 %v1114_v37  ;;  %2168 = vmatprep.mubr.msk.bf16.mxu1 %vm2399_vm2, %v2398_v9 }
 0x2cd   : > { %2178 = vmatprep.subr.bf16.mxu1 %v2398_v9 }
 0x2d3   : > { %2169 = vmatmul.mubr.msk.bf16.vlgmr.msra.gmra.mrb[12].mxu1 %vm757_vm3, %v1107_v38 }
 0x2d4   : > { %2182 = vmatprep.mubr.msk.bf16.mxu1 %vm2399_vm2, %v2398_v9 }
 0x38e   : > { %v798_v44 = vpop.f32.mrb[0].mxu1 }
 0x38f   : > { %v799_v45 = vadd.f32 %v798_v44, %v753_v43  ;;  %v2134_v46 = vpop.f32.mrb[1].mxu1 }
 0x390   : > { %v801_v47 = vpop.f32.mrb[2].mxu1 }
 0x391   : > { %v2135_v48 = vpop.f32.mrb[3].mxu1  ;;  %v804_v49 = vsel %vm757_vm3, %v799_v45, -inf }
 0x392   : > { %805 = vmax.xlane.f32.xlu1 %v804_v49 }
 0x396   : > { %v912_v50 = vpop.f32.mrb[4].mxu1 }
 0x397   : > { %v913_v51 = vadd.f32 %v912_v50, %v753_v43  ;;  %v2146_v52 = vpop.f32.mrb[5].mxu1 }
 0x398   : > { %v915_v53 = vpop.f32.mrb[6].mxu1 }
 0x399   : > { %v2147_v54 = vpop.f32.mrb[7].mxu1  ;;  %v918_v55 = vsel %vm757_vm3, %v913_v51, -inf }
 0x39a   : > { %919 = vmax.xlane.f32.xlu0 %v918_v55 }
 0x39e   : > { %v1031_v56 = vpop.f32.mrb[8].mxu1 }
 0x39f   : > { %v1032_v57 = vadd.f32 %v1031_v56, %v753_v43  ;;  %v2158_v58 = vpop.f32.mrb[9].mxu1 }
 0x3a0   : > { %v1034_v59 = vpop.f32.mrb[10].mxu1 }
 0x3a1   : > { %v2159_v60 = vpop.f32.mrb[11].mxu1  ;;  %v1037_v61 = vsel %vm757_vm3, %v1032_v57, -inf }
 0x3a2   : > { %1038 = vmax.xlane.f32.xlu1 %v1037_v61  ;;  %v2310_v60 = vld [vmem:[%s2546_s0] sm:$0xff]  }
 0x3a3   : > { %2179 = vmatpush3.bf16.msra.mxu1 %v2310_v60 }
 0x3a4   : > { %2180 = vmatprep.subr.bf16.mxu1 %v2398_v9 }
 0x3a6   : > { %v1150_v62 = vpop.f32.mrb[12].mxu1 }
 0x3a7   : > { %v1151_v63 = vadd.f32 %v1150_v62, %v753_v43  ;;  %v2170_v0 = vpop.f32.mrb[13].mxu1  ;;  %v2311_v62 = vld [vmem:[%s2546_s0 + $0x8] sm:$0xff]  }
 0x3a8   : > { %v1153_v2 = vpop.f32.mrb[14].mxu1  ;;  %2181 = vmatpush3.bf16.msra.mxu1 %v2311_v62 }
 0x3a9   : > { %v2171_v3 = vpop.f32.mrb[15].mxu1  ;;  %v1156_v4 = vsel %vm757_vm3, %v1151_v63, -inf  ;;  %2194 = vmatprep.subr.bf16.mxu1 %v2398_v9 }
 0x3aa   : > { %1157 = vmax.xlane.f32.xlu0 %v1156_v4 }
 0x41f   : > { %v806_v5 = vpop.xlane.xlu1 %805 }
 0x420   : > { %v807_v6 = vsub.f32 %v799_v45, %v806_v5 }
 0x422   : > { %v808_v7 = vmul.f32 1.442695, %v807_v6 }
 0x424   : > { %2324 = vpow2.f32 %v808_v7 }
 0x427   : > { %v920_v8 = vpop.xlane.xlu0 %919 }
 0x428   : > { %v921_v10 = vsub.f32 %v913_v51, %v920_v8 }
 0x42a   : > { %v922_v11 = vmul.f32 1.442695, %v921_v10 }
 0x42c   : > { %2326 = vpow2.f32 %v922_v11 }
 0x42e   : > { %v2325_v12 = vpop.eup %2324 }
 0x42f   : > { %v810_v13 = vsel %vm757_vm3, %v2325_v12, 0.0  ;;  %v1039_v21 = vpop.xlane.xlu1 %1038 }
 0x430   : > { %811 = vadd.xlane.f32.xlu1 %v810_v13  ;;  %v1040_v22 = vsub.f32 %v1032_v57, %v1039_v21 }
 0x432   : > { %v1041_v23 = vmul.f32 1.442695, %v1040_v22  ;;  %v2312_v22 = vld [vmem:[%s2563_s26] sm:$0xff]  }
 0x436   : > { %v2327_v14 = vpop.eup %2326 }
 0x437   : > { %v1158_v15 = vpop.xlane.xlu0 %1157  ;;  %v924_v16 = vsel %vm757_vm3, %v2327_v14, 0.0 }
 0x438   : > { %v1159_v17 = vsub.f32 %v1151_v63, %v1158_v15  ;;  %925 = vadd.xlane.f32.xlu0 %v924_v16 }
 0x43a   : > { %v1160_v18 = vmul.f32 1.442695, %v1159_v17 }
 0x43c   : > { %2328 = vpow2.f32 %v1160_v18 }
 0x43d   : > { %2330 = vpow2.f32 %v1041_v23  ;;  %v2313_v23 = vld [vmem:[%s2563_s26 + $0x8] sm:$0xff]   ;;  %s2415_s26 = smov 32  }
 0x441   : > { %816 = vrot.lane.b32.xlu1 %v2621_v26, %s2408_s29 }
 0x446   : > { %v2329_v19 = vpop.eup %2328 }
 0x447   : > { %v1162_v20 = vsel %vm757_vm3, %v2329_v19, 0.0  ;;  %v2331_v24 = vpop.eup %2330 }
 0x448   : > { %1163 = vadd.xlane.f32.xlu0 %v1162_v20  ;;  %v1043_v25 = vsel %vm757_vm3, %v2331_v24, 0.0 }
 0x45e   : > { %930 = vrot.lane.b32.xlu0 %v2621_v26, %s2409_s16 }
 0x465   : > { %1044 = vadd.xlane.f32.xlu1 %v1043_v25 }
 0x476   : > { %1049 = vrot.lane.b32.xlu1 %v2621_v26, %s2410_s19 }
 0x47a   : > { %1168 = vrot.lane.b32.xlu1 %v2621_v26, %s2411_s25 }
 0x4bd   : > { %v812_v27 = vpop.xlane.xlu1 %811 }
 0x4be   : > { %2332 = vrcp.f32 %v812_v27 }
 0x4c1   : > { %v817_v28 = vpop.permute.xlu1 %816 }
 0x4c2   : > { %v823_v29 = vsel %vm821_vm5, %v817_v28, 0 }
 0x4c3   : > { %2137 = vmatpush3.bf16.msra.mxu0 %v823_v29  ;;  %v2043_v29 = vld [vmem:[%s627_s13] ss:$0 sm:$0xff] }
 0x4c4   : > { %2148 = vmatprep.subr.bf16.mxu0 %v2398_v9 }
 0x4c5   : > { %v926_v31 = vpop.xlane.xlu0 %925 }
 0x4c6   : > { %2334 = vrcp.f32 %v926_v31 }
 0x4c8   : > { %v2333_v30 = vpop.eup %2332 }
 0x4c9   : > { %v814_v32 = vmul.f32 %v2333_v30, %v2325_v12 }
 0x4cb   : > { %v815_v33 = vpack.c.bf16 %v814_v32, %v814_v32 }
 0x4cd   : > { %2139 = vmatmul.mubr.msk.bf16.vlgmr.msra.gmra.mrb[4].mxu0 %vm757_vm3, %v815_v33 }
 0x4ce   : > { %2150 = vmatprep.mubr.msk.bf16.mxu0 %vm2399_vm2, %v2398_v9 }
 0x4d0   : > { %v2335_v26 = vpop.eup %2334 }
 0x4d1   : > { %v928_v35 = vmul.f32 %v2335_v26, %v2327_v14  ;;  %v2037_v14 = vld [vmem:[%s2837_s14] ss:$0 sm:$0xff] }
 0x4d3   : > { %v929_v38 = vpack.c.bf16 %v928_v35, %v928_v35  ;;  %v2041_v35 = vld [vmem:[%s2838_s30] ss:$0 sm:$0xff] }
 0x4d5   : > { %v1164_v34 = vpop.xlane.xlu0 %1163 }
 0x4d9   : > { %v931_v36 = vpop.permute.xlu0 %930 }
 0x4da   : > { %v936_v37 = vsel %vm821_vm5, %v931_v36, 0 }
 0x4db   : > { %2149 = vmatpush3.bf16.msra.mxu0 %v936_v37 }
 0x4dc   : > { %2160 = vmatprep.subr.bf16.mxu0 %v2398_v9 }
 0x4de   : > { %2151 = vmatmul.mubr.msk.bf16.vlgmr.msra.gmra.mrb[8].mxu0 %vm757_vm3, %v929_v38 }
 0x4df   : > { %2162 = vmatprep.mubr.msk.bf16.mxu0 %vm2399_vm2, %v2398_v9 }
 0x4f2   : > { %v1045_v39 = vpop.xlane.xlu1 %1044 }
 0x4f3   : > { %2336 = vrcp.f32 %v1045_v39 }
 0x4f4   : > { %2338 = vrcp.f32 %v1164_v34 }
 0x4f6   : > { %v1050_v40 = vpop.permute.xlu1 %1049 }
 0x4f7   : > { %v1055_v41 = vsel %vm821_vm5, %v1050_v40, 0 }
 0x4f8   : > { %2161 = vmatpush3.bf16.msra.mxu0 %v1055_v41  ;;  %v2314_v41 = vld [vmem:[%s2577_s22 + $0x10] sm:$0xff]  }
 0x4f9   : > { %2172 = vmatprep.subr.bf16.mxu0 %v2398_v9 }
 0x4fa   : > { %v1169_v44 = vpop.permute.xlu1 %1168 }
 0x4fb   : > { %v1174_v47 = vsel %vm821_vm5, %v1169_v44, 0  ;;  %v2317_v44 = vld [vmem:[%s2577_s22 + $0x8] sm:$0xff]  }
 0x4fd   : > { %v2337_v42 = vpop.eup %2336 }
 0x4fe   : > { %v1047_v43 = vmul.f32 %v2337_v42, %v2331_v24  ;;  %v2339_v46 = vpop.eup %2338  ;;  %v2315_v42 = vld [vmem:[%s2577_s22] sm:$0xff]  }
 0x4ff   : > { %v1166_v48 = vmul.f32 %v2339_v46, %v2329_v19 }
 0x500   : > { %v1048_v45 = vpack.c.bf16 %v1047_v43, %v1047_v43  ;;  %v2316_v43 = vld [vmem:[%s2577_s22 + $0x18] sm:$0xff]  }
 0x501   : > { %v1167_v49 = vpack.c.bf16 %v1166_v48, %v1166_v48 }
 0x502   : > { %2163 = vmatmul.mubr.msk.bf16.vlgmr.msra.gmra.mrb[12].mxu0 %vm757_vm3, %v1048_v45 }
 0x503   : > { %2173 = vmatpush3.bf16.msra.mxu0 %v1174_v47  ;;  %2174 = vmatprep.mubr.msk.bf16.mxu0 %vm2399_vm2, %v2398_v9 }
 0x504   : > { %2186 = vmatprep.subr.bf16.mxu0 %v2398_v9 }
 0x50a   : > { %2175 = vmatmul.mubr.msk.bf16.vlgmr.msra.gmra.mrb[16].mxu0 %vm757_vm3, %v1167_v49 }
 0x50b   : > { %2190 = vmatprep.mubr.msk.bf16.mxu0 %vm2399_vm2, %v2398_v9  ;;  %2187 = vmatpush3.bf16.msra.mxu0 %v2312_v22 }
 0x50c   : > { %2188 = vmatprep.subr.bf16.mxu0 %v2398_v9 }
 0x50f   : > { %2189 = vmatpush3.bf16.msra.mxu0 %v2313_v23 }
 0x510   : > { %2202 = vmatprep.subr.bf16.mxu0 %v2398_v9 }
 0x5a0   : > { %v859_v50 = vpop.f32.mrb[4].mxu0 }
 0x5a1   : > { %v865_v51 = vpack.c.bf16 %v859_v50, %v859_v50  ;;  %v2140_v52 = vpop.f32.mrb[5].mxu0 }
 0x5a2   : > { %v862_v53 = vpop.f32.mrb[6].mxu0 }
 0x5a3   : > { %867 = vst.msk [vmem:[#allocation2] sm:$0xf] %vm866_vm6, %v865_v51  ;;  %v2141_v54 = vpop.f32.mrb[7].mxu0 }
 0x5b1   : > { %v972_v55 = vpop.f32.mrb[8].mxu0 }
 0x5b2   : > { %v2073_v56 = vpack.c.bf16 %v972_v55, %v972_v55  ;;  %v2152_v57 = vpop.f32.mrb[9].mxu0 }
 0x5b3   : > { %v975_v58 = vpop.f32.mrb[10].mxu0 }
 0x5b4   : > { %982 = vrot.lane.b32.xlu0 %v2073_v56, %s2412_s17  ;;  %v2153_v59 = vpop.f32.mrb[11].mxu0 }
 0x5d5   : > { %v1091_v61 = vpop.f32.mrb[12].mxu0 }
 0x5d6   : > { %v2074_v63 = vpack.c.bf16 %v1091_v61, %v1091_v61  ;;  %v2164_v0 = vpop.f32.mrb[13].mxu0 }
 0x5d7   : > { %v1094_v2 = vpop.f32.mrb[14].mxu0 }
 0x5d8   : > { %1101 = vrot.lane.b32.xlu1 %v2074_v63, %s2413_s18  ;;  %v2165_v3 = vpop.f32.mrb[15].mxu0 }
 0x5dd   : > { %v1210_v4 = vpop.f32.mrb[16].mxu0 }
 0x5de   : > { %v2075_v5 = vpack.c.bf16 %v1210_v4, %v1210_v4  ;;  %v2176_v6 = vpop.f32.mrb[17].mxu0 }
 0x5df   : > { %v1213_v7 = vpop.f32.mrb[18].mxu0 }
 0x5e0   : > { %1220 = vrot.lane.b32.xlu0 %v2075_v5, %s2414_s20  ;;  %v2177_v8 = vpop.f32.mrb[19].mxu0 }
 0x626   : > { %v983_v10 = vpop.permute.xlu0 %982 }
 0x627   : > { %986 = vst.msk [vmem:[#allocation2] sm:$0xf] %vm985_vm7, %v983_v10 }
 0x64a   : > { %v1102_v11 = vpop.permute.xlu1 %1101 }
 0x64b   : > { %1105 = vst.msk [vmem:[#allocation2] sm:$0xf] %vm1104_vm8, %v1102_v11 }
 0x652   : > { %v1221_v12 = vpop.permute.xlu0 %1220 }
 0x653   : > { %1224 = vst.msk [vmem:[#allocation2] sm:$0xf] %vm1223_vm9, %v1221_v12  ;;  %v2318_v12 = vld [vmem:[%s2577_s22 + $0x20] sm:$0xff]  }
 0x65a   : > { %v1225_v13 = vld [vmem:[#allocation2] sm:$0xf] }
 0x65b   : > { %2183 = vmatmul.mubr.msk.bf16.vlgmr.msra.gmra.mrb[16].mxu1 %vm651_vm1, %v1225_v13  ;;  %v2319_v13 = vld [vmem:[%s2577_s22 + $0x28] sm:$0xff]  }
 0x65c   : > { %2198 = vmatprep.mubr.msk.bf16.mxu1 %vm2399_vm2, %v2398_v9 }
 0x72e   : > { %v1286_v15 = vpop.f32.mrb[16].mxu1 }
 0x72f   : > { %v1287_v16 = vadd.f32 %v2037_v14, %v1286_v15  ;;  %v2184_v17 = vpop.f32.mrb[17].mxu1 }
 0x730   : > { %v1289_v18 = vpop.f32.mrb[18].mxu1 }
 0x731   : > { %v2698_v19 = vadd.f32 %v1287_v16, %v2587_v1  ;;  %v2185_v20 = vpop.f32.mrb[19].mxu1 }
 0x733   : > { %v1295_v21 = vsel %vm651_vm1, %v2698_v19, 0.0 }
 0x734   : > { %1296 = vadd.xlane.f32.xlu1 %v1295_v21 }
 0x745   : > { %1404 = vrot.lane.b32.xlu1 %v2313_v23, %s2401_s24 }
 0x749   : > { %1408 = vrot.lane.b32.xlu1 %v2043_v29, %s2401_s24 }
 0x74d   : > { %1576 = vrot.lane.b32.xlu1 %v2313_v23, %s2408_s29 }
 0x751   : > { %1694 = vrot.lane.b32.xlu1 %v2313_v23, %s2415_s26 }
 0x755   : > { %1698 = vrot.lane.b32.xlu1 %v2043_v29, %s2415_s26 }
 0x7c1   : > { %v1297_v24 = vpop.xlane.xlu1 %1296 }
 0x7c2   : > { %v1298_v25 = vmul.f32 0.03125, %v1297_v24 }
 0x7c4   : > { %v1299_v1 = vsub.f32 %v2698_v19, %v1298_v25 }
 0x7c5   : > { %v1405_v26 = vpop.permute.xlu1 %1404 }
 0x7c6   : > { %v1300_v27 = vmul.f32 %v1299_v1, %v1299_v1 }
 0x7c8   : > { %v1301_v28 = vsel %vm651_vm1, %v1300_v27, 0.0 }
 0x7c9   : > { %1302 = vadd.xlane.f32.xlu0 %v1301_v28  ;;  %v1409_v45 = vpop.permute.xlu1 %1408 }
 0x7cd   : > { %v1577_v8 = vpop.permute.xlu1 %1576 }
 0x7d1   : > { %v1695_v11 = vpop.permute.xlu1 %1694 }
 0x7df   : > { %1402 = vrot.lane.b32.xlu0 %v2312_v22, %s2401_s24 }
 0x7e3   : > { %1574 = vrot.lane.b32.xlu0 %v2312_v22, %s2408_s29 }
 0x7e7   : > { %1692 = vrot.lane.b32.xlu0 %v2312_v22, %s2415_s26 }
 0x7eb   : > { %1580 = vrot.lane.b32.xlu0 %v2043_v29, %s2408_s29  ;;  %s2839_s29 = scalar_lea.vmem %s2806_s8, %s2520_s15 }
 0x7ec   : > { %v2042_v37 = vld [vmem:[%s2839_s29] ss:$0 sm:$0xff] }
 0x856   : > { %v1303_v30 = vpop.xlane.xlu0 %1302 }
 0x857   : > { %v1304_v31 = vmul.f32 0.03125, %v1303_v30 }
 0x859   : > { %v1305_v32 = vadd.f32 1e-05, %v1304_v31 }
 0x85a   : > { %v1403_v33 = vpop.permute.xlu0 %1402 }
 0x85b   : > { %2340 = vrsqrt.f32 %v1305_v32  ;;  %2195 = vmatpush3.bf16.msra.mxu1 %v1403_v33  ;;  %v1699_v32 = vpop.permute.xlu1 %1698 }
 0x85c   : > { %2196 = vmatprep.subr.bf16.mxu1 %v2398_v9 }
 0x85e   : > { %v1575_v7 = vpop.permute.xlu0 %1574 }
 0x85f   : > { %2197 = vmatpush3.bf16.msra.mxu1 %v1405_v26 }
 0x860   : > { %2210 = vmatprep.subr.bf16.mxu1 %v2398_v9 }
 0x862   : > { %v1693_v10 = vpop.permute.xlu0 %1692 }
 0x865   : > { %v2341_v34 = vpop.eup %2340 }
 0x866   : > { %v1307_v36 = vmul.f32 %v2341_v34, %v1299_v1  ;;  %v1581_v24 = vpop.permute.xlu0 %1580 }
 0x868   : > { %v1314_v38 = vmul.f32 %v2041_v35, %v1307_v36 }
 0x86a   : > { %v1321_v39 = vadd.f32 %v2042_v37, %v1314_v38 }
 0x86c   : > { %v2731_v40 = vpack.c.bf16 %v1321_v39, %v1321_v39 }
 0x86e   : > { %2191 = vmatmul.mubr.msk.bf16.vlgmr.msra.gmra.mrb[20].mxu0 %vm651_vm1, %v2731_v40  ;;  %2199 = vmatmul.mubr.msk.bf16.vlgmr.msra.gmra.mrb[20].mxu1 %vm651_vm1, %v2731_v40 }
 0x86f   : > { %2206 = vmatprep.mubr.msk.bf16.mxu0 %vm2399_vm2, %v2398_v9  ;;  %2214 = vmatprep.mubr.msk.bf16.mxu1 %vm2399_vm2, %v2398_v9 }
 0x870   : > { %2203 = vmatpush3.bf16.msra.mxu0 %v2314_v41  ;;  %2211 = vmatpush3.bf16.msra.mxu1 %v2315_v42 }
 0x871   : > { %2204 = vmatprep.subr.bf16.mxu0 %v2398_v9  ;;  %2212 = vmatprep.subr.bf16.mxu1 %v2398_v9 }
 0x874   : > { %2205 = vmatpush3.bf16.msra.mxu0 %v2316_v43  ;;  %2213 = vmatpush3.bf16.msra.mxu1 %v2317_v44 }
 0x875   : > { %2218 = vmatprep.subr.bf16.mxu0 %v2398_v9  ;;  %2226 = vmatprep.subr.bf16.mxu1 %v2398_v9 }
 0x941   : > { %v1383_v46 = vpop.f32.mrb[20].mxu0  ;;  %v1445_v47 = vpop.f32.mrb[20].mxu1 }
 0x942   : > { %v1384_v48 = vadd.f32 %v2043_v29, %v1383_v46  ;;  %v1446_v49 = vadd.f32 %v1445_v47, %v1409_v45  ;;  %v2192_v50 = vpop.f32.mrb[21].mxu0  ;;  %v2200_v51 = vpop.f32.mrb[21].mxu1  ;;  %v2320_v45 = vld [vmem:[%s2577_s22 + $0x30] sm:$0xff]   ;;  %v2321_v47 = vld [vmem:[%s2577_s22 + $0x38] sm:$0xff]  }
 0x943   : > { %v1386_v52 = vpop.f32.mrb[22].mxu0  ;;  %v1448_v53 = vpop.f32.mrb[22].mxu1 }
 0x944   : > { %v2047_v54 = vmul.f32 -1.702, %v1384_v48  ;;  %v2049_v55 = vmul.f32 -1.702, %v1446_v49  ;;  %v2193_v56 = vpop.f32.mrb[23].mxu0  ;;  %v2201_v57 = vpop.f32.mrb[23].mxu1 }
 0x946   : > { %v1391_v58 = vmul.f32 1.442695, %v2047_v54  ;;  %v1453_v59 = vmul.f32 1.442695, %v2049_v55 }
 0x948   : > { %2342 = vpow2.f32 %v1391_v58 }
 0x949   : > { %2344 = vpow2.f32 %v1453_v59 }
 0x952   : > { %v2343_v60 = vpop.eup %2342 }
 0x953   : > { %v2345_v61 = vpop.eup %2344  ;;  %v1393_v62 = vadd.f32 1.0, %v2343_v60 }
 0x954   : > { %v1455_v63 = vadd.f32 1.0, %v2345_v61 }
 0x955   : > { %2346 = vrcp.f32 %v1393_v62 }
 0x956   : > { %2348 = vrcp.f32 %v1455_v63 }
 0x95f   : > { %v2347_v0 = vpop.eup %2346 }
 0x960   : > { %v2349_v2 = vpop.eup %2348  ;;  %v1396_v3 = vmul.f32 %v2347_v0, %v1384_v48 }
 0x961   : > { %v1458_v4 = vmul.f32 %v2349_v2, %v1446_v49 }
 0x962   : > { %v1397_v5 = vpack.c.bf16 %v1396_v3, %v1396_v3 }
 0x963   : > { %v1459_v6 = vpack.c.bf16 %v1458_v4, %v1458_v4 }
 0x964   : > { %2215 = vmatmul.mubr.msk.bf16.vlgmr.msra.gmra.mrb[24].mxu1 %vm651_vm1, %v1397_v5 }
 0x965   : > { %2207 = vmatmul.mubr.msk.bf16.vlgmr.msra.gmra.mrb[24].mxu0 %vm651_vm1, %v1459_v6  ;;  %2230 = vmatprep.mubr.msk.bf16.mxu1 %vm2399_vm2, %v2398_v9 }
 0x966   : > { %2219 = vmatpush3.bf16.msra.mxu0 %v1575_v7  ;;  %2222 = vmatprep.mubr.msk.bf16.mxu0 %vm2399_vm2, %v2398_v9 }
 0x967   : > { %2220 = vmatprep.subr.bf16.mxu0 %v2398_v9  ;;  %2227 = vmatpush3.bf16.msra.mxu1 %v2318_v12 }
 0x968   : > { %2228 = vmatprep.subr.bf16.mxu1 %v2398_v9 }
 0x96a   : > { %2221 = vmatpush3.bf16.msra.mxu0 %v1577_v8 }
 0x96b   : > { %2234 = vmatprep.subr.bf16.mxu0 %v2398_v9  ;;  %2229 = vmatpush3.bf16.msra.mxu1 %v2319_v13 }
 0x96c   : > { %2242 = vmatprep.subr.bf16.mxu1 %v2398_v9 }
 0x96d   : > { %2223 = vmatmul.mubr.msk.bf16.vlgmr.msra.gmra.mrb[28].mxu0 %vm651_vm1, %v2731_v40 }
 0x96e   : > { %2235 = vmatpush3.bf16.msra.mxu0 %v1693_v10  ;;  %2238 = vmatprep.mubr.msk.bf16.mxu0 %vm2399_vm2, %v2398_v9 }
 0x96f   : > { %2236 = vmatprep.subr.bf16.mxu0 %v2398_v9 }
 0x972   : > { %2237 = vmatpush3.bf16.msra.mxu0 %v1695_v11 }
 0x975   : > { %2239 = vmatmul.mubr.msk.bf16.vlgmr.msra.gmra.mrb[32].mxu0 %vm651_vm1, %v2731_v40 }
 0xa37   : > { %v1568_v14 = vpop.f32.mrb[24].mxu1 }
 0xa38   : > { %v1513_v15 = vpop.f32.mrb[24].mxu0  ;;  %v2216_v16 = vpop.f32.mrb[25].mxu1 }
 0xa39   : > { %v1569_v17 = vadd.f32 %v1568_v14, %v1513_v15  ;;  %v2208_v18 = vpop.f32.mrb[25].mxu0  ;;  %v1571_v20 = vpop.f32.mrb[26].mxu1 }
 0xa3a   : > { %v1516_v21 = vpop.f32.mrb[26].mxu0  ;;  %v2217_v22 = vpop.f32.mrb[27].mxu1 }
 0xa3b   : > { %v2209_v23 = vpop.f32.mrb[27].mxu0 }
 0xa40   : > { %v1617_v25 = vpop.f32.mrb[28].mxu0 }
 0xa41   : > { %v1618_v1 = vadd.f32 %v1617_v25, %v1581_v24  ;;  %v2224_v27 = vpop.f32.mrb[29].mxu0 }
 0xa42   : > { %v1620_v28 = vpop.f32.mrb[30].mxu0 }
 0xa43   : > { %v2057_v29 = vmul.f32 -1.702, %v1618_v1  ;;  %v2225_v30 = vpop.f32.mrb[31].mxu0 }
 0xa45   : > { %v1625_v31 = vmul.f32 1.442695, %v2057_v29 }
 0xa47   : > { %2350 = vpow2.f32 %v1625_v31 }
 0xa48   : > { %v1735_v33 = vpop.f32.mrb[32].mxu0 }
 0xa49   : > { %v1736_v26 = vadd.f32 %v1735_v33, %v1699_v32  ;;  %v2240_v34 = vpop.f32.mrb[33].mxu0 }
 0xa4a   : > { %v1738_v35 = vpop.f32.mrb[34].mxu0 }
 0xa4b   : > { %v2062_v36 = vmul.f32 -1.702, %v1736_v26  ;;  %v2241_v37 = vpop.f32.mrb[35].mxu0 }
 0xa4d   : > { %v1743_v38 = vmul.f32 1.442695, %v2062_v36 }
 0xa4f   : > { %2352 = vpow2.f32 %v1743_v38 }
 0xa51   : > { %v2351_v39 = vpop.eup %2350 }
 0xa52   : > { %v1627_v40 = vadd.f32 1.0, %v2351_v39 }
 0xa54   : > { %2354 = vrcp.f32 %v1627_v40 }
 0xa59   : > { %v2353_v41 = vpop.eup %2352 }
 0xa5a   : > { %v1745_v42 = vadd.f32 1.0, %v2353_v41 }
 0xa5c   : > { %2356 = vrcp.f32 %v1745_v42 }
 0xa5e   : > { %v2355_v43 = vpop.eup %2354 }
 0xa5f   : > { %v1630_v44 = vmul.f32 %v2355_v43, %v1618_v1 }
 0xa61   : > { %v1631_v46 = vpack.c.bf16 %v1630_v44, %v1630_v44 }
 0xa63   : > { %2231 = vmatmul.mubr.msk.bf16.vlgmr.msra.gmra.mrb[28].mxu1 %vm651_vm1, %v1631_v46 }
 0xa64   : > { %2243 = vmatpush3.bf16.msra.mxu1 %v2320_v45  ;;  %2246 = vmatprep.mubr.msk.bf16.mxu1 %vm2399_vm2, %v2398_v9 }
 0xa65   : > { %2244 = vmatprep.subr.bf16.mxu1 %v2398_v9  ;;  %v2066_v9 = vld [vmem:[%s635_s23] ss:$0 sm:$0xff] }
 0xa66   : > { %v2357_v48 = vpop.eup %2356 }
 0xa67   : > { %v1748_v49 = vmul.f32 %v2357_v48, %v1736_v26 }
 0xa68   : > { %2245 = vmatpush3.bf16.msra.mxu1 %v2321_v47 }
 0xa69   : > { %v1749_v50 = vpack.c.bf16 %v1748_v49, %v1748_v49 }
 0xa6b   : > { %2247 = vmatmul.mubr.msk.bf16.vlgmr.msra.gmra.mrb[32].mxu1 %vm651_vm1, %v1749_v50 }
 0xb36   : > { %v1685_v51 = vpop.f32.mrb[28].mxu1 }
 0xb37   : > { %v1691_v52 = vadd.f32 %v1685_v51, %v1569_v17  ;;  %v2232_v53 = vpop.f32.mrb[29].mxu1 }
 0xb38   : > { %v1688_v54 = vpop.f32.mrb[30].mxu1 }
 0xb39   : > { %v2233_v55 = vpop.f32.mrb[31].mxu1 }
 0xb3e   : > { %v1803_v56 = vpop.f32.mrb[32].mxu1 }
 0xb3f   : > { %v1809_v57 = vadd.f32 %v1803_v56, %v1691_v52  ;;  %v2248_v58 = vpop.f32.mrb[33].mxu1 }
 0xb40   : > { %v1806_v59 = vpop.f32.mrb[34].mxu1 }
 0xb41   : > { %v1810_v60 = vadd.f32 %v1809_v57, %v2698_v19  ;;  %v2249_v61 = vpop.f32.mrb[35].mxu1 }
 0xb43   : > { %v1818_v62 = vadd.f32 %v2066_v9, %v1810_v60 }
 0xb45   : > { %1819 = vst.msk [vmem:[%s2582_s2] sm:$0xff] %vm651_vm1, %v1818_v62 }
 0xb46 PF: > { %s2840_s19 = sld [smem:[#allocation6_spill]]  ;;  %s2841_s25 = sld [smem:[#allocation4_spill]] }
 0xb47   : > { %s2842_s26 = sld [smem:[#allocation5_spill]]  ;;  %s2843_s27 = sld [smem:[#allocation7_spill]] }
 0xb48   : > { %s2844_s28 = sld [smem:[#allocation8_spill]] }
 0xb4c   : > { %s23_s29 = sadd.s32 1, %s2840_s19  }
 0xb4d   : > { %p20_p8 = scmp.ge.s32.totalorder %s23_s29, 6  }
 0xb4f   :  { %22 = sbr.rel (!%p20_p8) target bundleno = 6 (0x6), region = 142 }

</bundles_post_ra>
